<compile_context>
chip_gen: v6e
topology: v6e:2x2x1
jax: 0.10.0
libtpu: 0.0.40
codegen_flags: <defaults>
</compile_context>

<pallas_src>
import functools

import jax
import jax.numpy as jnp
from jax.experimental import pallas as pl
from jax.experimental.pallas import tpu as pltpu

LN_EPS = 1e-5                      # torch.nn.LayerNorm default eps
BOND_VOCABS = (5, 6, 2)            # per-bond-feature vocab sizes (BondEncoder)
BOND_OFFSETS = (0, 5, 11)          # row offsets into the stacked embedding table
V_TOT = sum(BOND_VOCABS)


def _round_up(v, m):
    return ((v + m - 1) // m) * m


def _pad2(a, rows, cols):
    out = jnp.zeros((rows, cols), a.dtype)
    return out.at[: a.shape[0], : a.shape[1]].set(a)


def _pad_row(v, cols):
    out = jnp.zeros((1, cols), v.dtype)
    return out.at[0, : v.shape[0]].set(v)


# ------------------------------ kernels -------------------------------------


def _gine_msg_kernel(xsrc_ref, eemb_ref, msg_ref):
    """Per-edge GINE message: relu(x_j + e_ji), computed once per edge tile."""
    msg_ref[...] = jnp.maximum(xsrc_ref[...] + eemb_ref[...], 0.0).astype(
        jnp.bfloat16)


def _gine_node_kernel(eps_ref, msg_ref, scat_ref, x_ref, w1_ref, b1_ref,
                      mask_ref, gam_ref, bet_ref, w2_ref, b2_ref, out_ref,
                      *, emb_dim):
    """Scatter-sum aggregation + (1+eps) self term + Linear->LN->ReLU->Linear."""
    inv_d = 1.0 / float(emb_dim)
    eps = eps_ref[0, 0]
    mask = mask_ref[...]                          # 1.0 on real emb columns

    # Scatter-sum of the precomputed edge messages into this node tile (MXU).
    agg = jnp.dot(scat_ref[...], msg_ref[...],
                  preferred_element_type=jnp.float32)

    # GINE update: (1 + eps) * x_i + sum_{j->i} relu(x_j + e_ji)
    z = (1.0 + eps) * x_ref[...] + agg

    # MLP: Linear -> LayerNorm(emb_dim) -> ReLU -> Linear
    # Padded columns of h are forced to zero so LN statistics over the real
    # emb_dim are exact regardless of how the weights were padded.
    h = (jnp.dot(z.astype(jnp.bfloat16), w1_ref[...],
                 preferred_element_type=jnp.float32) + b1_ref[...]) * mask
    mu = jnp.sum(h, axis=-1, keepdims=True) * inv_d
    c = (h - mu) * mask                           # masked two-pass moments
    var = jnp.sum(c * c, axis=-1, keepdims=True) * inv_d
    hn = c * jax.lax.rsqrt(var + LN_EPS) * gam_ref[...] + bet_ref[...]
    hn = jnp.maximum(hn, 0.0)

    # Output kept f32 for the exactness check; flip to bf16 if consumer allows.
    out_ref[...] = jnp.dot(hn.astype(jnp.bfloat16), w2_ref[...],
                           preferred_element_type=jnp.float32) + b2_ref[...]


# ------------------------------ wrapper ------------------------------------


def gine_forward_pallas(params, x, edge_index, edge_attr, *,
                        in_dim, emb_dim, tile_m=256, tile_e=256):
    """tile_m: 256 is MXU-native M on v6e/v7x; use 128 on v5e (4x128x128 MXU)."""
    n = x.shape[0]
    e = edge_index.shape[1]

    d_pad = _round_up(in_dim, 128)
    h_pad = _round_up(emb_dim, 128)
    tm = min(tile_m, _round_up(n, 128))
    n_pad = _round_up(n, tm)
    te = min(tile_e, _round_up(e, 128))
    e_pad = _round_up(e, te)

    src, dst = edge_index[0], edge_index[1]
    offs = jnp.asarray(BOND_OFFSETS, jnp.int32)

    # ---- Hoisted, grid-invariant edge-side preprocessing (done ONCE) --------
    # BondEncoder: sum of per-feature embeddings; plus gather of source rows.
    edge_emb = jnp.take(params["bond_table"], edge_attr + offs[None, :],
                        axis=0).sum(axis=1)                        # (E, in_dim)
    x_src = jnp.take(x, src, axis=0)                               # (E, in_dim)

    x_src_p = _pad2(x_src, e_pad, d_pad)
    eemb_p = _pad2(edge_emb, e_pad, d_pad)

    # Pass 1: per-edge messages, computed once (not per node tile).
    msg = pl.pallas_call(
        _gine_msg_kernel,
        out_shape=jax.ShapeDtypeStruct((e_pad, d_pad), jnp.bfloat16),
        grid=(e_pad // te,),
        in_specs=[pl.BlockSpec((te, d_pad), lambda i: (i, 0)),
                  pl.BlockSpec((te, d_pad), lambda i: (i, 0))],
        out_specs=pl.BlockSpec((te, d_pad), lambda i: (i, 0)),
        compiler_params=pltpu.CompilerParams(
            dimension_semantics=("parallel",)),
    )(x_src_p, eemb_p)

    # ---- Node-side inputs ----------------------------------------------------
    # Dense one-hot scatter matrix S[dst, e] (exact in bf16).
    scat = jax.nn.one_hot(dst, n_pad, dtype=jnp.float32).T         # (n_pad, E)
    scat = _pad2(scat, n_pad, e_pad).astype(jnp.bfloat16)

    x_p = _pad2(x, n_pad, d_pad)                                   # f32 self term
    w1 = _pad2(params["w1"], d_pad, h_pad).astype(jnp.bfloat16)
    w2 = _pad2(params["w2"], h_pad, h_pad).astype(jnp.bfloat16)
    b1 = _pad_row(params["b1"], h_pad)
    gam = _pad_row(params["gamma"], h_pad)
    bet = _pad_row(params["beta"], h_pad)
    b2 = _pad_row(params["b2"], h_pad)
    colmask = _pad_row(jnp.ones((emb_dim,), jnp.float32), h_pad)
    eps = jnp.reshape(params["eps"].astype(jnp.float32), (1, 1))

    # Grid-invariant blocks: single-buffered (no point double-buffering a block
    # whose index never changes) -> halves their resident VMEM footprint.
    const = lambda shape: pl.BlockSpec(shape, lambda i: (0, 0),
                                       pipeline_mode=pl.Buffered(1))
    tiled = lambda shape: pl.BlockSpec(shape, lambda i: (i, 0))

    # Explicit VMEM budget (matters on v7x: 64 MiB physical / 32 MiB default).
    resident = 2 * (e_pad * d_pad + d_pad * h_pad + h_pad * h_pad) \
        + 4 * 5 * h_pad
    streamed = 2 * (2 * tm * e_pad + 4 * tm * d_pad + 4 * tm * h_pad)
    vmem_bytes = int(min(48 * 2**20, max(16 * 2**20, 2 * (resident + streamed))))

    out_pad = pl.pallas_call(
        functools.partial(_gine_node_kernel, emb_dim=emb_dim),
        out_shape=jax.ShapeDtypeStruct((n_pad, h_pad), jnp.float32),
        grid=(n_pad // tm,),
        in_specs=[
            pl.BlockSpec((1, 1), lambda i: (0, 0),
                         memory_space=pltpu.MemorySpace.SMEM),   # eps
            const((e_pad, d_pad)),    # per-edge messages (bf16, resident)
            tiled((tm, e_pad)),       # scatter rows S[dst, e] for this tile
            tiled((tm, d_pad)),       # x row tile (f32, self term)
            const((d_pad, h_pad)),    # w1
            const((1, h_pad)),        # b1
            const((1, h_pad)),        # LayerNorm column mask
            const((1, h_pad)),        # gamma
            const((1, h_pad)),        # beta
            const((h_pad, h_pad)),    # w2
            const((1, h_pad)),        # b2
        ],
        out_specs=tiled((tm, h_pad)),
        compiler_params=pltpu.CompilerParams(
            dimension_semantics=("parallel",),
            vmem_limit_bytes=vmem_bytes),
    )(eps, msg, scat, x_p, w1, b1, colmask, gam, bet, w2, b2)

    return out_pad[:n, :emb_dim]


# ------------------------- parameters & reference ---------------------------


def _linear_init(key, fan_in, fan_out):
    """torch.nn.Linear default init: U(-1/sqrt(fan_in), 1/sqrt(fan_in))."""
    kw, kb = jax.random.split(key)
    lim = 1.0 / (fan_in ** 0.5)
    w = jax.random.uniform(kw, (fan_in, fan_out), jnp.float32, -lim, lim)
    b = jax.random.uniform(kb, (fan_out,), jnp.float32, -lim, lim)
    return w, b


def make_params(key, in_dim, emb_dim):
    k1, k2, kt = jax.random.split(key, 3)
    w1, b1 = _linear_init(k1, in_dim, emb_dim)
    w2, b2 = _linear_init(k2, emb_dim, emb_dim)
    return {
        "eps": jnp.zeros((), jnp.float32),                   # train_eps init 0
        "w1": w1, "b1": b1,
        "gamma": jnp.ones((emb_dim,), jnp.float32),          # LayerNorm weight
        "beta": jnp.zeros((emb_dim,), jnp.float32),          # LayerNorm bias
        "w2": w2, "b2": b2,
        "bond_table": jax.random.normal(kt, (V_TOT, in_dim), jnp.float32),
    }


def gine_reference(params, x, edge_index, edge_attr):
    """Pure-JAX f32 reference of the PyTorch forward."""
    src, dst = edge_index[0], edge_index[1]
    offs = jnp.asarray(BOND_OFFSETS, jnp.int32)
    e_emb = jnp.take(params["bond_table"], edge_attr + offs[None, :],
                     axis=0).sum(axis=1)
    msg = jax.nn.relu(x[src] + e_emb)
    agg = jnp.zeros_like(x).at[dst].add(msg)
    z = (1.0 + params["eps"]) * x + agg
    h = z @ params["w1"] + params["b1"]
    mu = jnp.mean(h, axis=-1, keepdims=True)
    var = jnp.mean((h - mu) ** 2, axis=-1, keepdims=True)
    h = (h - mu) / jnp.sqrt(var + LN_EPS) * params["gamma"] + params["beta"]
    h = jax.nn.relu(h)
    return h @ params["w2"] + params["b2"]


# -------------------------------- driver ------------------------------------


if __name__ == "__main__":
    N_NODES, N_EDGES = 200, 400
    IN_DIM, EMB_DIM = 16, 32

    root = jax.random.PRNGKey(0)
    kx, ksrc, kdst, kattr, kp = jax.random.split(root, 5)

    x = jax.random.normal(kx, (N_NODES, IN_DIM), jnp.float32)
    src = jax.random.randint(ksrc, (N_EDGES,), 0, N_NODES)
    dst = jax.random.randint(kdst, (N_EDGES,), 0, N_NODES)
    edge_index = jnp.stack([src, dst], axis=0)                      # (2, E)
    edge_attr = jnp.stack(
        [jax.random.randint(k, (N_EDGES,), 0, v)
         for k, v in zip(jax.random.split(kattr, len(BOND_VOCABS)),
                         BOND_VOCABS)],
        axis=1).astype(jnp.int32)                                   # (E, 3)

    params = make_params(kp, IN_DIM, EMB_DIM)

    # tile_m=128 / tile_e=128 here: exercises multiple grid tiles at this small
    # graph size (and matches v5e's 128-wide MXU).  Defaults are 256 for v6e/v7x.
    fwd = jax.jit(functools.partial(gine_forward_pallas,
                                    in_dim=IN_DIM, emb_dim=EMB_DIM,
                                    tile_m=128, tile_e=128))
    out = jax.block_until_ready(fwd(params, x, edge_index, edge_attr))

    assert out.shape == (N_NODES, EMB_DIM) and out.dtype == jnp.float32
    assert bool(jnp.all(jnp.isfinite(out)))

    ref = gine_reference(params, x, edge_index, edge_attr)
    max_err = float(jnp.max(jnp.abs(out - ref)))
    # bf16 MXU inputs with f32 accumulation -> small numeric deviation only.
    assert max_err < 0.25, f"max abs error vs f32 reference: {max_err}"

    print("KERNEL_OK")
</pallas_src>

<mosaic_0001>
module attributes {stable_mosaic.version = 11 : i64} {
  func.func @_gine_msg_kernel(%arg0: i32, %arg1: memref<128x128xf32, #tpu.memory_space<vmem>>, %arg2: memref<128x128xf32, #tpu.memory_space<vmem>>, %arg3: memref<128x128xbf16, #tpu.memory_space<vmem>>) attributes {dimension_semantics = [#tpu.dimension_semantics<parallel>], iteration_bounds = array<i64: 4>, scalar_prefetch = 0 : i64, scratch_operands = 0 : i64, tpu.core_type = #tpu.core_type<tc>, window_params = [{transform_indices = @transform_0, window_bounds = array<i64: 128, 128>}, {transform_indices = @transform_1, window_bounds = array<i64: 128, 128>}, {transform_indices = @transform_2, window_bounds = array<i64: 128, 128>}]} {
    %c0 = arith.constant 0 : index
    %c0_0 = arith.constant 0 : index
    %0 = vector.load %arg1[%c0, %c0_0] : memref<128x128xf32, #tpu.memory_space<vmem>>, vector<128x128xf32>
    %c0_1 = arith.constant 0 : index
    %c0_2 = arith.constant 0 : index
    %1 = vector.load %arg2[%c0_1, %c0_2] : memref<128x128xf32, #tpu.memory_space<vmem>>, vector<128x128xf32>
    %2 = arith.addf %0, %1 : vector<128x128xf32>
    %cst = arith.constant 0.000000e+00 : f32
    %3 = vector.broadcast %cst : f32 to vector<128x128xf32>
    %4 = arith.maximumf %2, %3 : vector<128x128xf32>
    %5 = arith.truncf %4 : vector<128x128xf32> to vector<128x128xbf16>
    %c0_3 = arith.constant 0 : index
    %c0_4 = arith.constant 0 : index
    %6 = vector.load %arg3[%c0_3, %c0_4] : memref<128x128xbf16, #tpu.memory_space<vmem>>, vector<128x128xbf16>
    tpu.vector_store %arg3[%c0_3, %c0_4], %5 {strides = array<i32>} : memref<128x128xbf16, #tpu.memory_space<vmem>>, vector<128x128xbf16>,
    return
  }
  func.func @transform_0(%arg0: i32) -> (i32, i32) {
    %c0_i32 = arith.constant 0 : i32
    %c0_i32_0 = arith.constant 0 : i32
    return %arg0, %c0_i32 : i32, i32
  }
  func.func @transform_1(%arg0: i32) -> (i32, i32) {
    %c0_i32 = arith.constant 0 : i32
    %c0_i32_0 = arith.constant 0 : i32
    return %arg0, %c0_i32 : i32, i32
  }
  func.func @transform_2(%arg0: i32) -> (i32, i32) {
    %c0_i32 = arith.constant 0 : i32
    %c0_i32_0 = arith.constant 0 : i32
    return %arg0, %c0_i32 : i32, i32
  }
}

module attributes {stable_mosaic.version = 11 : i64} {
  func.func @_gine_node_kernel(%arg0: i32, %arg1: memref<1x1xf32, #tpu.memory_space<smem>>, %arg2: memref<512x128xbf16, #tpu.memory_space<vmem>>, %arg3: memref<128x512xbf16, #tpu.memory_space<vmem>>, %arg4: memref<128x128xf32, #tpu.memory_space<vmem>>, %arg5: memref<128x128xbf16, #tpu.memory_space<vmem>>, %arg6: memref<1x128xf32, #tpu.memory_space<vmem>>, %arg7: memref<1x128xf32, #tpu.memory_space<vmem>>, %arg8: memref<1x128xf32, #tpu.memory_space<vmem>>, %arg9: memref<1x128xf32, #tpu.memory_space<vmem>>, %arg10: memref<128x128xbf16, #tpu.memory_space<vmem>>, %arg11: memref<1x128xf32, #tpu.memory_space<vmem>>, %arg12: memref<128x128xf32, #tpu.memory_space<vmem>>) attributes {dimension_semantics = [#tpu.dimension_semantics<parallel>], iteration_bounds = array<i64: 2>, scalar_prefetch = 0 : i64, scratch_operands = 0 : i64, tpu.core_type = #tpu.core_type<tc>, window_params = [{transform_indices = @transform_0, window_bounds = array<i64: 1, 1>}, {pipeline_mode = #tpu.pipeline_mode<synchronous>, transform_indices = @transform_1, window_bounds = array<i64: 512, 128>}, {transform_indices = @transform_2, window_bounds = array<i64: 128, 512>}, {transform_indices = @transform_3, window_bounds = array<i64: 128, 128>}, {pipeline_mode = #tpu.pipeline_mode<synchronous>, transform_indices = @transform_4, window_bounds = array<i64: 128, 128>}, {pipeline_mode = #tpu.pipeline_mode<synchronous>, transform_indices = @transform_5, window_bounds = array<i64: 1, 128>}, {pipeline_mode = #tpu.pipeline_mode<synchronous>, transform_indices = @transform_6, window_bounds = array<i64: 1, 128>}, {pipeline_mode = #tpu.pipeline_mode<synchronous>, transform_indices = @transform_7, window_bounds = array<i64: 1, 128>}, {pipeline_mode = #tpu.pipeline_mode<synchronous>, transform_indices = @transform_8, window_bounds = array<i64: 1, 128>}, {pipeline_mode = #tpu.pipeline_mode<synchronous>, transform_indices = @transform_9, window_bounds = array<i64: 128, 128>}, {pipeline_mode = #tpu.pipeline_mode<synchronous>, transform_indices = @transform_10, window_bounds = array<i64: 1, 128>}, {transform_indices = @transform_11, window_bounds = array<i64: 128, 128>}]} {
    %c0 = arith.constant 0 : index
    %c0_0 = arith.constant 0 : index
    %0 = memref.load %arg1[%c0, %c0_0] : memref<1x1xf32, #tpu.memory_space<smem>>
    %c0_1 = arith.constant 0 : index
    %c0_2 = arith.constant 0 : index
    %1 = vector.load %arg7[%c0_1, %c0_2] : memref<1x128xf32, #tpu.memory_space<vmem>>, vector<1x128xf32>
    %c0_3 = arith.constant 0 : index
    %c0_4 = arith.constant 0 : index
    %2 = vector.load %arg3[%c0_3, %c0_4] : memref<128x512xbf16, #tpu.memory_space<vmem>>, vector<128x512xbf16>
    %c0_5 = arith.constant 0 : index
    %c0_6 = arith.constant 0 : index
    %3 = vector.load %arg2[%c0_5, %c0_6] : memref<512x128xbf16, #tpu.memory_space<vmem>>, vector<512x128xbf16>
    %cst = arith.constant dense<0.000000e+00> : vector<128x128xf32>
    %4 = tpu.matmul %2, %3, %cst {dimension_numbers = #tpu.dot_dimension_numbers<[1], [0], [0], [1], [0, 0, 1, 1], [], []>} : vector<128x512xbf16>, vector<512x128xbf16>, vector<128x128xf32> -> vector<128x128xf32>
    %cst_7 = arith.constant 1.000000e+00 : f32
    %5 = arith.addf %cst_7, %0 : f32
    %c0_8 = arith.constant 0 : index
    %c0_9 = arith.constant 0 : index
    %6 = vector.load %arg4[%c0_8, %c0_9] : memref<128x128xf32, #tpu.memory_space<vmem>>, vector<128x128xf32>
    %7 = vector.broadcast %5 : f32 to vector<128x128xf32>
    %8 = arith.mulf %7, %6 : vector<128x128xf32>
    %9 = arith.addf %8, %4 : vector<128x128xf32>
    %10 = arith.truncf %9 : vector<128x128xf32> to vector<128x128xbf16>
    %c0_10 = arith.constant 0 : index
    %c0_11 = arith.constant 0 : index
    %11 = vector.load %arg5[%c0_10, %c0_11] : memref<128x128xbf16, #tpu.memory_space<vmem>>, vector<128x128xbf16>
    %cst_12 = arith.constant dense<0.000000e+00> : vector<128x128xf32>
    %12 = tpu.matmul %10, %11, %cst_12 {dimension_numbers = #tpu.dot_dimension_numbers<[1], [0], [0], [1], [0, 0, 1, 1], [], []>} : vector<128x128xbf16>, vector<128x128xbf16>, vector<128x128xf32> -> vector<128x128xf32>
    %c0_13 = arith.constant 0 : index
    %c0_14 = arith.constant 0 : index
    %13 = vector.load %arg6[%c0_13, %c0_14] : memref<1x128xf32, #tpu.memory_space<vmem>>, vector<1x128xf32>
    %14 = vector.broadcast %13 : vector<1x128xf32> to vector<128x128xf32>
    %15 = arith.addf %12, %14 : vector<128x128xf32>
    %16 = vector.broadcast %1 : vector<1x128xf32> to vector<128x128xf32>
    %17 = arith.mulf %15, %16 : vector<128x128xf32>
    %cst_15 = arith.constant dense<0.000000e+00> : vector<128xf32>
    %18 = vector.multi_reduction <add>, %17, %cst_15 [1] : vector<128x128xf32> to vector<128xf32>
    %19 = vector.shape_cast %18 : vector<128xf32> to vector<128x1xf32>
    %cst_16 = arith.constant 3.125000e-02 : f32
    %20 = vector.broadcast %cst_16 : f32 to vector<128x1xf32>
    %21 = arith.mulf %19, %20 : vector<128x1xf32>
    %22 = vector.broadcast %21 : vector<128x1xf32> to vector<128x128xf32>
    %23 = arith.subf %17, %22 : vector<128x128xf32>
    %24 = vector.broadcast %1 : vector<1x128xf32> to vector<128x128xf32>
    %25 = arith.mulf %23, %24 : vector<128x128xf32>
    %26 = arith.mulf %25, %25 : vector<128x128xf32>
    %cst_17 = arith.constant dense<0.000000e+00> : vector<128xf32>
    %27 = vector.multi_reduction <add>, %26, %cst_17 [1] : vector<128x128xf32> to vector<128xf32>
    %28 = vector.shape_cast %27 : vector<128xf32> to vector<128x1xf32>
    %cst_18 = arith.constant 3.125000e-02 : f32
    %29 = vector.broadcast %cst_18 : f32 to vector<128x1xf32>
    %30 = arith.mulf %28, %29 : vector<128x1xf32>
    %cst_19 = arith.constant 9.99999974E-6 : f32
    %31 = vector.broadcast %cst_19 : f32 to vector<128x1xf32>
    %32 = arith.addf %30, %31 : vector<128x1xf32>
    %33 = math.rsqrt %32 : vector<128x1xf32>
    %34 = vector.broadcast %33 : vector<128x1xf32> to vector<128x128xf32>
    %35 = arith.mulf %25, %34 : vector<128x128xf32>
    %c0_20 = arith.constant 0 : index
    %c0_21 = arith.constant 0 : index
    %36 = vector.load %arg8[%c0_20, %c0_21] : memref<1x128xf32, #tpu.memory_space<vmem>>, vector<1x128xf32>
    %37 = vector.broadcast %36 : vector<1x128xf32> to vector<128x128xf32>
    %38 = arith.mulf %35, %37 : vector<128x128xf32>
    %c0_22 = arith.constant 0 : index
    %c0_23 = arith.constant 0 : index
    %39 = vector.load %arg9[%c0_22, %c0_23] : memref<1x128xf32, #tpu.memory_space<vmem>>, vector<1x128xf32>
    %40 = vector.broadcast %39 : vector<1x128xf32> to vector<128x128xf32>
    %41 = arith.addf %38, %40 : vector<128x128xf32>
    %cst_24 = arith.constant 0.000000e+00 : f32
    %42 = vector.broadcast %cst_24 : f32 to vector<128x128xf32>
    %43 = arith.maximumf %41, %42 : vector<128x128xf32>
    %44 = arith.truncf %43 : vector<128x128xf32> to vector<128x128xbf16>
    %c0_25 = arith.constant 0 : index
    %c0_26 = arith.constant 0 : index
    %45 = vector.load %arg10[%c0_25, %c0_26] : memref<128x128xbf16, #tpu.memory_space<vmem>>, vector<128x128xbf16>
    %cst_27 = arith.constant dense<0.000000e+00> : vector<128x128xf32>
    %46 = tpu.matmul %44, %45, %cst_27 {dimension_numbers = #tpu.dot_dimension_numbers<[1], [0], [0], [1], [0, 0, 1, 1], [], []>} : vector<128x128xbf16>, vector<128x128xbf16>, vector<128x128xf32> -> vector<128x128xf32>
    %c0_28 = arith.constant 0 : index
    %c0_29 = arith.constant 0 : index
    %47 = vector.load %arg11[%c0_28, %c0_29] : memref<1x128xf32, #tpu.memory_space<vmem>>, vector<1x128xf32>
    %48 = vector.broadcast %47 : vector<1x128xf32> to vector<128x128xf32>
    %49 = arith.addf %46, %48 : vector<128x128xf32>
    %c0_30 = arith.constant 0 : index
    %c0_31 = arith.constant 0 : index
    %50 = vector.load %arg12[%c0_30, %c0_31] : memref<128x128xf32, #tpu.memory_space<vmem>>, vector<128x128xf32>
    tpu.vector_store %arg12[%c0_30, %c0_31], %49 {strides = array<i32>} : memref<128x128xf32, #tpu.memory_space<vmem>>, vector<128x128xf32>,
    return
  }
  func.func @transform_0(%arg0: i32) -> (i32, i32) {
    %c0_i32 = arith.constant 0 : i32
    %c0_i32_0 = arith.constant 0 : i32
    %c0_i32_1 = arith.constant 0 : i32
    return %c0_i32, %c0_i32_0 : i32, i32
  }
  func.func @transform_1(%arg0: i32) -> (i32, i32) {
    %c0_i32 = arith.constant 0 : i32
    %c0_i32_0 = arith.constant 0 : i32
    %c0_i32_1 = arith.constant 0 : i32
    return %c0_i32, %c0_i32_0 : i32, i32
  }
  func.func @transform_2(%arg0: i32) -> (i32, i32) {
    %c0_i32 = arith.constant 0 : i32
    %c0_i32_0 = arith.constant 0 : i32
    return %arg0, %c0_i32 : i32, i32
  }
  func.func @transform_3(%arg0: i32) -> (i32, i32) {
    %c0_i32 = arith.constant 0 : i32
    %c0_i32_0 = arith.constant 0 : i32
    return %arg0, %c0_i32 : i32, i32
  }
  func.func @transform_4(%arg0: i32) -> (i32, i32) {
    %c0_i32 = arith.constant 0 : i32
    %c0_i32_0 = arith.constant 0 : i32
    %c0_i32_1 = arith.constant 0 : i32
    return %c0_i32, %c0_i32_0 : i32, i32
  }
  func.func @transform_5(%arg0: i32) -> (i32, i32) {
    %c0_i32 = arith.constant 0 : i32
    %c0_i32_0 = arith.constant 0 : i32
    %c0_i32_1 = arith.constant 0 : i32
    return %c0_i32, %c0_i32_0 : i32, i32
  }
  func.func @transform_6(%arg0: i32) -> (i32, i32) {
    %c0_i32 = arith.constant 0 : i32
    %c0_i32_0 = arith.constant 0 : i32
    %c0_i32_1 = arith.constant 0 : i32
    return %c0_i32, %c0_i32_0 : i32, i32
  }
  func.func @transform_7(%arg0: i32) -> (i32, i32) {
    %c0_i32 = arith.constant 0 : i32
    %c0_i32_0 = arith.constant 0 : i32
    %c0_i32_1 = arith.constant 0 : i32
    return %c0_i32, %c0_i32_0 : i32, i32
  }
  func.func @transform_8(%arg0: i32) -> (i32, i32) {
    %c0_i32 = arith.constant 0 : i32
    %c0_i32_0 = arith.constant 0 : i32
    %c0_i32_1 = arith.constant 0 : i32
    return %c0_i32, %c0_i32_0 : i32, i32
  }
  func.func @transform_9(%arg0: i32) -> (i32, i32) {
    %c0_i32 = arith.constant 0 : i32
    %c0_i32_0 = arith.constant 0 : i32
    %c0_i32_1 = arith.constant 0 : i32
    return %c0_i32, %c0_i32_0 : i32, i32
  }
  func.func @transform_10(%arg0: i32) -> (i32, i32) {
    %c0_i32 = arith.constant 0 : i32
    %c0_i32_0 = arith.constant 0 : i32
    %c0_i32_1 = arith.constant 0 : i32
    return %c0_i32, %c0_i32_0 : i32, i32
  }
  func.func @transform_11(%arg0: i32) -> (i32, i32) {
    %c0_i32 = arith.constant 0 : i32
    %c0_i32_0 = arith.constant 0 : i32
    return %arg0, %c0_i32 : i32, i32
  }
}

</mosaic_0001>

<bundles_post_ra>
// kernel: gine_forward_pallas.2
= control target key start
LH: loop header
LB: loop body
LE: loop exit
PB: predicated region body
PF: predicated region fallthrough
CT: control target
= control target key end

     0   :  { %s504_s9 = smov 0   ;;  %s574_s0 = inlined_call_operand.vmem [shape: f32[512,128], index: 0, kind: input, shape index: {}]   ;;  %s575_s1 = inlined_call_operand.vmem [shape: f32[512,128], index: 1, kind: input, shape index: {}]   ;;  %s576_s2 = inlined_call_operand.vmem [shape: bf16[512,128], index: 2, kind: output, shape index: {}]  }
   0x1 LB: > { %s381_s10 = sadd.s32 4294967295, %s487_s9   ;;  %p385_p0 = scmp.ge.s32.totalorder %s487_s9, 1  ;;  %s487_s9 = sphi %s504_s9, %s12_s9  }
   0x2   : > { %p124_p1 = scmp.lt.s32.totalorder %s487_s9, 5 }
   0x4   : > { %p125_p2 = pnand %p385_p0, %p124_p1 }
   0x5   : > { %s386_s11 = sshll.u32 (!%p125_p2), %s381_s10, 4 }
   0x6   : > { %128 = sbr.rel (%p125_p2) target bundleno = 32 (0x20), region = 28  ;;  %p152_p3 = scmp.lt.s32.totalorder (!%p125_p2), %s386_s11, 63 }
   0xb   : > { %s578_s11 = smov (!%p152_p3, %s386_s11), 63 }
   0xc   : > { %s387_s12 = sshll.u32 %s578_s11, 3  ;;  %s391_s19 = sshll.u32 %s578_s11, 2 }
   0xd   : > { %s518_s15 = scalar_lea.vmem %s574_s0, %s387_s12  ;;  %s523_s18 = scalar_lea.vmem %s575_s1, %s387_s12 }
   0xe   : > { %v169_v0 = vld [vmem:[%s518_s15] sm:$0xff]  ;;  %v170_v1 = vld [vmem:[%s518_s15 + $0x8] sm:$0xff]  ;;  %v171_v5 = vld [vmem:[%s518_s15 + $0x10] sm:$0xff]  ;;  %s544_s22 = scalar_lea.vmem %s576_s2, %s391_s19 }
   0xf   : > { %v185_v2 = vld [vmem:[%s523_s18] sm:$0xff]  ;;  %v186_v3 = vld [vmem:[%s523_s18 + $0x8] sm:$0xff]  ;;  %v172_v6 = vld [vmem:[%s518_s15 + $0x18] sm:$0xff] }
  0x10   : > { %v201_v4 = vadd.f32 %v185_v2, %v169_v0  ;;  %v202_v7 = vadd.f32 %v186_v3, %v170_v1  ;;  %v187_v8 = vld [vmem:[%s523_s18 + $0x10] sm:$0xff]  ;;  %v188_v9 = vld [vmem:[%s523_s18 + $0x18] sm:$0xff]  ;;  %v173_v10 = vld [vmem:[%s518_s15 + $0x20] sm:$0xff] }
  0x11   : > { %v203_v12 = vadd.f32 %v187_v8, %v171_v5  ;;  %v204_v13 = vadd.f32 %v188_v9, %v172_v6  ;;  %v174_v14 = vld [vmem:[%s518_s15 + $0x28] sm:$0xff]  ;;  %v189_v15 = vld [vmem:[%s523_s18 + $0x20] sm:$0xff]  ;;  %v175_v20 = vld [vmem:[%s518_s15 + $0x30] sm:$0xff] }
  0x12   : > { %v217_v11 = vmax.f32 %v201_v4, 0.0  ;;  %v190_v16 = vld [vmem:[%s523_s18 + $0x28] sm:$0xff]  ;;  %v218_v17 = vmax.f32 %v202_v7, 0.0  ;;  %v205_v18 = vadd.f32 %v189_v15, %v173_v10  ;;  %v176_v21 = vld [vmem:[%s518_s15 + $0x38] sm:$0xff]  ;;  %v191_v22 = vld [vmem:[%s523_s18 + $0x30] sm:$0xff] }
  0x13   : > { %v206_v19 = vadd.f32 %v190_v16, %v174_v14  ;;  %v219_v23 = vmax.f32 %v203_v12, 0.0  ;;  %v220_v24 = vmax.f32 %v204_v13, 0.0  ;;  %v192_v25 = vld [vmem:[%s523_s18 + $0x38] sm:$0xff]  ;;  %v207_v26 = vadd.f32 %v191_v22, %v175_v20  ;;  %v177_v27 = vld [vmem:[%s518_s15 + $0x40] sm:$0xff]  ;;  %v178_v28 = vld [vmem:[%s518_s15 + $0x48] sm:$0xff] }
  0x14   : > { %v429_v29 = vpack.c.bf16 %v218_v17, %v217_v11  ;;  %v221_v30 = vmax.f32 %v205_v18, 0.0  ;;  %v208_v32 = vadd.f32 %v192_v25, %v176_v21  ;;  %v193_v33 = vld [vmem:[%s523_s18 + $0x40] sm:$0xff]  ;;  %v194_v34 = vld [vmem:[%s523_s18 + $0x48] sm:$0xff]  ;;  %v179_v35 = vld [vmem:[%s518_s15 + $0x50] sm:$0xff] }
  0x15   : > { %v222_v31 = vmax.f32 %v206_v19, 0.0  ;;  %v434_v36 = vpack.c.bf16 %v220_v24, %v219_v23  ;;  %v223_v37 = vmax.f32 %v207_v26, 0.0  ;;  %v209_v38 = vadd.f32 %v193_v33, %v177_v27  ;;  %v180_v40 = vld [vmem:[%s518_s15 + $0x58] sm:$0xff]  ;;  %v195_v41 = vld [vmem:[%s523_s18 + $0x50] sm:$0xff]  ;;  %v181_v47 = vld [vmem:[%s518_s15 + $0x60] sm:$0xff] }
  0x16   : > { %v210_v39 = vadd.f32 %v194_v34, %v178_v28  ;;  %v196_v42 = vld [vmem:[%s523_s18 + $0x58] sm:$0xff]  ;;  %430 = vst [vmem:[%s544_s22] sm:$0xff] %v429_v29   ;;  %v224_v44 = vmax.f32 %v208_v32, 0.0  ;;  %v211_v45 = vadd.f32 %v195_v41, %v179_v35  ;;  %v182_v48 = vld [vmem:[%s518_s15 + $0x68] sm:$0xff]  ;;  %v197_v49 = vld [vmem:[%s523_s18 + $0x60] sm:$0xff] }
  0x17   : > { %v439_v43 = vpack.c.bf16 %v222_v31, %v221_v30  ;;  %v212_v46 = vadd.f32 %v196_v42, %v180_v40  ;;  %466 = vst [vmem:[%s544_s22 + $0x8] sm:$0xff] %v434_v36   ;;  %v225_v50 = vmax.f32 %v209_v38, 0.0  ;;  %v198_v52 = vld [vmem:[%s523_s18 + $0x68] sm:$0xff]  ;;  %v213_v53 = vadd.f32 %v197_v49, %v181_v47  ;;  %v183_v54 = vld [vmem:[%s518_s15 + $0x70] sm:$0xff]  ;;  %v184_v55 = vld [vmem:[%s518_s15 + $0x78] sm:$0xff] }
  0x18   : > { %v226_v51 = vmax.f32 %v210_v39, 0.0  ;;  %v444_v56 = vpack.c.bf16 %v224_v44, %v223_v37  ;;  %v227_v57 = vmax.f32 %v211_v45, 0.0  ;;  %v214_v59 = vadd.f32 %v198_v52, %v182_v48  ;;  %v199_v60 = vld [vmem:[%s523_s18 + $0x70] sm:$0xff]  ;;  %v200_v61 = vld [vmem:[%s523_s18 + $0x78] sm:$0xff] }
  0x19   : > { %467 = vst [vmem:[%s544_s22 + $0x10] sm:$0xff] %v439_v43   ;;  %v228_v58 = vmax.f32 %v212_v46, 0.0  ;;  %v229_v63 = vmax.f32 %v213_v53, 0.0  ;;  %v215_v0 = vadd.f32 %v199_v60, %v183_v54  ;;  %v216_v1 = vadd.f32 %v200_v61, %v184_v55 }
  0x1a   : > { %v449_v62 = vpack.c.bf16 %v226_v51, %v225_v50  ;;  %468 = vst [vmem:[%s544_s22 + $0x18] sm:$0xff] %v444_v56   ;;  %v230_v3 = vmax.f32 %v214_v59, 0.0 }
  0x1b   : > { %v454_v2 = vpack.c.bf16 %v228_v58, %v227_v57  ;;  %v231_v4 = vmax.f32 %v215_v0, 0.0  ;;  %v232_v5 = vmax.f32 %v216_v1, 0.0 }
  0x1c   : > { %469 = vst [vmem:[%s544_s22 + $0x20] sm:$0xff] %v449_v62   ;;  %v459_v6 = vpack.c.bf16 %v230_v3, %v229_v63 }
  0x1d   : > { %470 = vst [vmem:[%s544_s22 + $0x28] sm:$0xff] %v454_v2   ;;  %v464_v7 = vpack.c.bf16 %v232_v5, %v231_v4 }
  0x1e   : > { %471 = vst [vmem:[%s544_s22 + $0x30] sm:$0xff] %v459_v6  }
  0x1f   : > { %472 = vst [vmem:[%s544_s22 + $0x38] sm:$0xff] %v464_v7  }
  0x20 PF: > { %s12_s9 = sadd.s32 1, %s487_s9  }
  0x21   : > { %p9_p4 = scmp.ge.s32.totalorder %s12_s9, 6  }
  0x23   :  { %11 = sbr.rel (!%p9_p4) target bundleno = 1 (0x1), region = 61 }

// kernel: gine_forward_pallas.3
= control target key start
LH: loop header
LB: loop body
LE: loop exit
PB: predicated region body
PF: predicated region fallthrough
CT: control target
= control target key end

     0   :  { %s2354_s19 = smov 0   ;;  %s2845_s0 = inlined_call_operand.<no memory space> [shape: f32[1,1], index: 0, kind: input, shape index: {}]   ;;  %s2846_s1 = inlined_call_operand.vmem [shape: bf16[512,128], index: 1, kind: input, shape index: {}]   ;;  %s2847_s2 = inlined_call_operand.vmem [shape: bf16[256,512], index: 2, kind: input, shape index: {}]   ;;  %s2848_s3 = inlined_call_operand.vmem [shape: f32[256,128], index: 3, kind: input, shape index: {}]   ;;  %s2849_s4 = inlined_call_operand.vmem [shape: bf16[128,128], index: 4, kind: input, shape index: {}]   ;;  %s2850_s5 = inlined_call_operand.vmem [shape: f32[1,128], index: 5, kind: input, shape index: {}]   ;;  %s2851_s6 = inlined_call_operand.vmem [shape: f32[1,128], index: 6, kind: input, shape index: {}]   ;;  %s2852_s7 = inlined_call_operand.vmem [shape: f32[1,128], index: 7, kind: input, shape index: {}]   ;;  %s2853_s8 = inlined_call_operand.vmem [shape: f32[1,128], index: 8, kind: input, shape index: {}]   ;;  %s2854_s9 = inlined_call_operand.vmem [shape: bf16[128,128], index: 9, kind: input, shape index: {}]   ;;  %s2855_s10 = inlined_call_operand.vmem [shape: f32[1,128], index: 10, kind: input, shape index: {}]   ;;  %s2856_s11 = inlined_call_operand.vmem [shape: f32[256,128], index: 11, kind: output, shape index: {}]  }
   0x1   :  { %16 = sst [smem:[#allocation2]] %s2845_s0 }
   0x2 LB: > { %s1823_s20 = sadd.s32 4294967295, %s2289_s19   ;;  %p1827_p0 = scmp.ge.s32.totalorder %s2289_s19, 1  ;;  %s2289_s19 = sphi %s2354_s19, %s22_s19  }
   0x3   : > { %p351_p1 = scmp.lt.s32.totalorder %s2289_s19, 3 }
   0x5   : > { %p352_p2 = pnand %p1827_p0, %p351_p1 }
   0x6   : > { %s1828_s15 = sshll.u32 (!%p352_p2), %s1823_s20, 4  ;;  %s417_s13 = sld [smem:[#allocation2]] (!%p352_p2) }
   0x7   : > { %355 = sbr.rel (%p352_p2) target bundleno = 1031 (0x407), region = 64  ;;  %p398_p3 = scmp.lt.s32.totalorder (!%p352_p2), %s1828_s15, 31 }
   0xc   : > { %v2155_v0 = vld [vmem:[%s2846_s1 + $0x78] sm:$0xff]   ;;  %v2159_v4 = vld [vmem:[%s2846_s1 + $0x70] sm:$0xff]   ;;  %v2163_v8 = vld [vmem:[%s2846_s1 + $0x68] sm:$0xff]   ;;  %s2858_s15 = smov (!%p398_p3, %s1828_s15), 31  ;;  %s1061_s16 = sadd.f32 1.0, %s417_s13 }
   0xd   : > { %v2156_v1 = vld [vmem:[%s2846_s1 + $0xf8] sm:$0xff]   ;;  %1923 = vmatprep.subr.bf16.mxu0 %v2155_v0  ;;  %v2160_v5 = vld [vmem:[%s2846_s1 + $0xf0] sm:$0xff]   ;;  %v2164_v9 = vld [vmem:[%s2846_s1 + $0xe8] sm:$0xff]   ;;  %s1922_s22 = sshll.u32 %s2858_s15, 4  ;;  %s1832_s14 = sshll.u32 %s2858_s15, 3 }
   0xe   : > { %v2157_v2 = vld [vmem:[%s2846_s1 + $0x38] sm:$0xff]   ;;  %1987 = vmatprep.subr.bf16.mxu1 %v2156_v1  ;;  %v2161_v6 = vld [vmem:[%s2846_s1 + $0x30] sm:$0xff]   ;;  %v2165_v10 = vld [vmem:[%s2846_s1 + $0x28] sm:$0xff]   ;;  %s2460_s29 = scalar_lea.vmem %s2847_s2, %s1922_s22  ;;  %s2530_s21 = scalar_lea.vmem %s2848_s3, %s1832_s14 }
   0xf   : > { %v2158_v3 = vld [vmem:[%s2846_s1 + $0xb8] sm:$0xff]   ;;  %1924 = vmatpush3.bf16.msra.mxu0 %v2157_v2  ;;  %v2162_v7 = vld [vmem:[%s2846_s1 + $0xb0] sm:$0xff]   ;;  %v2166_v11 = vld [vmem:[%s2846_s1 + $0xa8] sm:$0xff]   ;;  %s2824_s12 = scalar_lea.vmem %s2856_s11, %s1832_s14 }
  0x10   : > { %1988 = vmatpush3.bf16.msra.mxu1 %v2158_v3  ;;  %1925 = vmatprep.subr.bf16.mxu0 %v2159_v4  ;;  %v2167_v12 = vld [vmem:[%s2846_s1 + $0x60] sm:$0xff]   ;;  %v2171_v16 = vld [vmem:[%s2846_s1 + $0x58] sm:$0xff]   ;;  %v2175_v20 = vld [vmem:[%s2846_s1 + $0x50] sm:$0xff]  }
  0x11   : > { %1989 = vmatprep.subr.bf16.mxu1 %v2160_v5  ;;  %v2168_v13 = vld [vmem:[%s2846_s1 + $0xe0] sm:$0xff]   ;;  %v2172_v17 = vld [vmem:[%s2846_s1 + $0xd8] sm:$0xff]   ;;  %v2176_v21 = vld [vmem:[%s2846_s1 + $0xd0] sm:$0xff]  }
  0x12   : > { %v2169_v14 = vld [vmem:[%s2846_s1 + $0x20] sm:$0xff]   ;;  %v2173_v18 = vld [vmem:[%s2846_s1 + $0x18] sm:$0xff]   ;;  %v2177_v22 = vld [vmem:[%s2846_s1 + $0x10] sm:$0xff]  }
  0x13   : > { %1926 = vmatpush3.bf16.msra.mxu0 %v2161_v6  ;;  %v2170_v15 = vld [vmem:[%s2846_s1 + $0xa0] sm:$0xff]   ;;  %v2174_v19 = vld [vmem:[%s2846_s1 + $0x98] sm:$0xff]   ;;  %v2178_v23 = vld [vmem:[%s2846_s1 + $0x90] sm:$0xff]  }
  0x14   : > { %1990 = vmatpush3.bf16.msra.mxu1 %v2162_v7  ;;  %1927 = vmatprep.subr.bf16.mxu0 %v2163_v8  ;;  %v2179_v24 = vld [vmem:[%s2846_s1 + $0x48] sm:$0xff]   ;;  %v2183_v28 = vld [vmem:[%s2846_s1 + $0x40] sm:$0xff]   ;;  %v2235_v47 = vld [vmem:[%s2849_s4 + $0x38] sm:$0xff]  }
  0x15   : > { %1991 = vmatprep.subr.bf16.mxu1 %v2164_v9  ;;  %v2180_v25 = vld [vmem:[%s2846_s1 + $0xc8] sm:$0xff]   ;;  %v2184_v29 = vld [vmem:[%s2846_s1 + $0xc0] sm:$0xff]   ;;  %v2236_v50 = vld [vmem:[%s2849_s4 + $0x30] sm:$0xff]  }
  0x16   : > { %v2181_v26 = vld [vmem:[%s2846_s1 + $0x8] sm:$0xff]   ;;  %v2185_v30 = vld [vmem:[%s2846_s1] sm:$0xff]   ;;  %v2239_v4 = vld [vmem:[%s2849_s4 + $0x18] sm:$0xff]  }
  0x17   : > { %1928 = vmatpush3.bf16.msra.mxu0 %v2165_v10  ;;  %v2182_v27 = vld [vmem:[%s2846_s1 + $0x88] sm:$0xff]   ;;  %v2186_v31 = vld [vmem:[%s2846_s1 + $0x80] sm:$0xff]   ;;  %v2240_v5 = vld [vmem:[%s2849_s4 + $0x10] sm:$0xff]  }
  0x18   : > { %1992 = vmatpush3.bf16.msra.mxu1 %v2166_v11  ;;  %1929 = vmatprep.subr.bf16.mxu0 %v2167_v12  ;;  %v2187_v32 = vld [vmem:[%s2460_s29] ss:$16 sps:$4 sm:$0xff]   ;;  %v2189_v33 = vld [vmem:[%s2460_s29 + $0x4] ss:$16 sps:$4 sm:$0xff]   ;;  %v2190_v34 = vld [vmem:[%s2460_s29 + $0x8] ss:$16 sps:$4 sm:$0xff]  }
  0x19   : > { %1993 = vmatprep.subr.bf16.mxu1 %v2168_v13  ;;  %v2192_v35 = vld [vmem:[%s2460_s29 + $0xc] ss:$16 sps:$4 sm:$0xff]   ;;  %899 = vmatprep.mubr.bf16.mxu0 %v2189_v33  ;;  %v2193_v36 = vld [vmem:[%s2460_s29 + $0x24] ss:$16 sps:$4 sm:$0xff]   ;;  %v2197_v38 = vld [vmem:[%s2460_s29 + $0x20] ss:$16 sps:$4 sm:$0xff]  }
  0x1a   : > { %996 = vmatprep.mubr.bf16.mxu1 %v2192_v35  ;;  %v2195_v37 = vld [vmem:[%s2460_s29 + $0x2c] ss:$16 sps:$4 sm:$0xff]   ;;  %v2198_v39 = vld [vmem:[%s2460_s29 + $0x28] ss:$16 sps:$4 sm:$0xff]   ;;  %v2199_v40 = vld [vmem:[%s2460_s29 + $0x44] ss:$16 sps:$4 sm:$0xff]  }
  0x1b   : > { %1930 = vmatpush3.bf16.msra.mxu0 %v2169_v14  ;;  %v2201_v41 = vld [vmem:[%s2460_s29 + $0x4c] ss:$16 sps:$4 sm:$0xff]   ;;  %v2203_v42 = vld [vmem:[%s2460_s29 + $0x40] ss:$16 sps:$4 sm:$0xff]   ;;  %v2204_v43 = vld [vmem:[%s2460_s29 + $0x48] ss:$16 sps:$4 sm:$0xff]  }
  0x1c   : > { %1994 = vmatpush3.bf16.msra.mxu1 %v2170_v15  ;;  %1931 = vmatprep.subr.bf16.mxu0 %v2171_v16  ;;  %v2205_v44 = vld [vmem:[%s2460_s29 + $0x64] ss:$16 sps:$4 sm:$0xff]   ;;  %v2207_v45 = vld [vmem:[%s2460_s29 + $0x6c] ss:$16 sps:$4 sm:$0xff]   ;;  %v2209_v46 = vld [vmem:[%s2460_s29 + $0x60] ss:$16 sps:$4 sm:$0xff]   ;;  %v2533_v16 = vstv %s1061_s16 }
  0x1d   : > { %1995 = vmatprep.subr.bf16.mxu1 %v2172_v17  ;;  %v2210_v48 = vld [vmem:[%s2460_s29 + $0x68] ss:$16 sps:$4 sm:$0xff]   ;;  %v2211_v49 = vld [vmem:[%s2460_s29 + $0x84] ss:$16 sps:$4 sm:$0xff]   ;;  %v2213_v51 = vld [vmem:[%s2460_s29 + $0x8c] ss:$16 sps:$4 sm:$0xff]  }
  0x1e   : > { %v2237_v52 = vld [vmem:[%s2849_s4 + $0x28] sm:$0xff]   ;;  %v2215_v53 = vld [vmem:[%s2460_s29 + $0x80] ss:$16 sps:$4 sm:$0xff]   ;;  %v2217_v55 = vld [vmem:[%s2460_s29 + $0xa4] ss:$16 sps:$4 sm:$0xff]  }
  0x1f   : > { %1932 = vmatpush3.bf16.msra.mxu0 %v2173_v18  ;;  %v2216_v54 = vld [vmem:[%s2460_s29 + $0x88] ss:$16 sps:$4 sm:$0xff]   ;;  %v2219_v56 = vld [vmem:[%s2460_s29 + $0xac] ss:$16 sps:$4 sm:$0xff]   ;;  %v2221_v57 = vld [vmem:[%s2460_s29 + $0xa0] ss:$16 sps:$4 sm:$0xff]  }
  0x20   : > { %1996 = vmatpush3.bf16.msra.mxu1 %v2174_v19  ;;  %1933 = vmatprep.subr.bf16.mxu0 %v2175_v20  ;;  %v2222_v58 = vld [vmem:[%s2460_s29 + $0xa8] ss:$16 sps:$4 sm:$0xff]   ;;  %v2223_v59 = vld [vmem:[%s2460_s29 + $0xc4] ss:$16 sps:$4 sm:$0xff]   ;;  %v2225_v60 = vld [vmem:[%s2460_s29 + $0xcc] ss:$16 sps:$4 sm:$0xff]  }
  0x21   : > { %1997 = vmatprep.subr.bf16.mxu1 %v2176_v21  ;;  %v2227_v61 = vld [vmem:[%s2460_s29 + $0xc0] ss:$16 sps:$4 sm:$0xff]   ;;  %v2228_v62 = vld [vmem:[%s2460_s29 + $0xc8] ss:$16 sps:$4 sm:$0xff]   ;;  %v2229_v63 = vld [vmem:[%s2460_s29 + $0xe4] ss:$16 sps:$4 sm:$0xff]  }
  0x22   : > { %v2231_v0 = vld [vmem:[%s2460_s29 + $0xec] ss:$16 sps:$4 sm:$0xff]   ;;  %v2233_v1 = vld [vmem:[%s2460_s29 + $0xe0] ss:$16 sps:$4 sm:$0xff]   ;;  %v2234_v2 = vld [vmem:[%s2460_s29 + $0xe8] ss:$16 sps:$4 sm:$0xff]  }
  0x23   : > { %1934 = vmatpush3.bf16.msra.mxu0 %v2177_v22  ;;  %v2238_v3 = vld [vmem:[%s2849_s4 + $0x20] sm:$0xff]   ;;  %v2241_v6 = vld [vmem:[%s2849_s4 + $0x8] sm:$0xff]  }
  0x24   : > { %1998 = vmatpush3.bf16.msra.mxu1 %v2178_v23  ;;  %1935 = vmatprep.subr.bf16.mxu0 %v2179_v24  ;;  %v2242_v7 = vld [vmem:[%s2849_s4] sm:$0xff]   ;;  %v1063_v18 = vld [vmem:[%s2530_s21 + $0x8] sm:$0xff] }
  0x25   : > { %1999 = vmatprep.subr.bf16.mxu1 %v2180_v25  ;;  %v1062_v15 = vld [vmem:[%s2530_s21] sm:$0xff]  ;;  %v1080_v25 = vmul.f32 %v2533_v16, %v1063_v18 }
  0x26   : > { %v1079_v23 = vmul.f32 %v2533_v16, %v1062_v15 }
  0x27   : > { %1936 = vmatpush3.bf16.msra.mxu0 %v2181_v26 }
  0x28   : > { %2000 = vmatpush3.bf16.msra.mxu1 %v2182_v27  ;;  %1937 = vmatprep.subr.bf16.mxu0 %v2183_v28 }
  0x29   : > { %2001 = vmatprep.subr.bf16.mxu1 %v2184_v29 }
  0x2b   : > { %1938 = vmatpush3.bf16.msra.mxu0 %v2185_v30 }
  0x2c   : > { %2002 = vmatpush3.bf16.msra.mxu1 %v2186_v31  ;;  %2083 = vmatprep.subr.bf16.mxu0 %v2235_v47 }
  0x2e   : > { %900 = vmatmul.mubr.bf16.vlgmr.msra.gmra.mxu0 %v2187_v32 }
  0x2f   : > { %997 = vmatmul.mubr.bf16.vlgmr.msra.gmra.mxu1 %v2190_v34  ;;  %907 = vmatprep.mubr.bf16.mxu0 %v2193_v36  ;;  %v1064_v36 = vld [vmem:[%s2530_s21 + $0x10] sm:$0xff] }
  0x30   : > { %1004 = vmatprep.mubr.bf16.mxu1 %v2195_v37  ;;  %2084 = vmatpush3.bf16.msra.mxu0 %v2235_v47 }
  0x31   : > { %2085 = vmatprep.subr.bf16.mxu0 %v2236_v50 }
  0x34   : > { %2086 = vmatpush3.bf16.msra.mxu0 %v2236_v50 }
  0x35   : > { %2087 = vmatprep.subr.bf16.mxu0 %v2237_v52 }
  0x36   : > { %908 = vmatmul.mubr.bf16.gmra.mxu0 %v2197_v38  ;;  %v1065_v38 = vld [vmem:[%s2530_s21 + $0x18] sm:$0xff] }
  0x37   : > { %1005 = vmatmul.mubr.bf16.gmra.mxu1 %v2198_v39  ;;  %915 = vmatprep.mubr.bf16.mxu0 %v2199_v40 }
  0x38   : > { %1012 = vmatprep.mubr.bf16.mxu1 %v2201_v41  ;;  %2088 = vmatpush3.bf16.msra.mxu0 %v2237_v52 }
  0x39   : > { %2089 = vmatprep.subr.bf16.mxu0 %v2238_v3 }
  0x3c   : > { %2090 = vmatpush3.bf16.msra.mxu0 %v2238_v3 }
  0x3d   : > { %2091 = vmatprep.subr.bf16.mxu0 %v2239_v4 }
  0x3e   : > { %916 = vmatmul.mubr.bf16.gmra.mxu0 %v2203_v42 }
  0x3f   : > { %1013 = vmatmul.mubr.bf16.gmra.mxu1 %v2204_v43  ;;  %923 = vmatprep.mubr.bf16.mxu0 %v2205_v44  ;;  %v1081_v44 = vmul.f32 %v2533_v16, %v1064_v36  ;;  %v1070_v36 = vld [vmem:[%s2530_s21 + $0x40] sm:$0xff] }
  0x40   : > { %1020 = vmatprep.mubr.bf16.mxu1 %v2207_v45  ;;  %2092 = vmatpush3.bf16.msra.mxu0 %v2239_v4 }
  0x41   : > { %2093 = vmatprep.subr.bf16.mxu0 %v2240_v5 }
  0x44   : > { %2094 = vmatpush3.bf16.msra.mxu0 %v2240_v5 }
  0x45   : > { %2095 = vmatprep.subr.bf16.mxu0 %v2241_v6 }
  0x46   : > { %924 = vmatmul.mubr.bf16.gmra.mxu0 %v2209_v46  ;;  %v1082_v46 = vmul.f32 %v2533_v16, %v1065_v38  ;;  %v1071_v38 = vld [vmem:[%s2530_s21 + $0x48] sm:$0xff] }
  0x47   : > { %1021 = vmatmul.mubr.bf16.gmra.mxu1 %v2210_v48  ;;  %931 = vmatprep.mubr.bf16.mxu0 %v2211_v49 }
  0x48   : > { %1028 = vmatprep.mubr.bf16.mxu1 %v2213_v51  ;;  %2096 = vmatpush3.bf16.msra.mxu0 %v2241_v6 }
  0x49   : > { %2097 = vmatprep.subr.bf16.mxu0 %v2242_v7 }
  0x4c   : > { %2098 = vmatpush3.bf16.msra.mxu0 %v2242_v7 }
  0x4e   : > { %932 = vmatmul.mubr.bf16.gmra.mxu0 %v2215_v53 }
  0x4f   : > { %1029 = vmatmul.mubr.bf16.gmra.mxu1 %v2216_v54  ;;  %939 = vmatprep.mubr.bf16.mxu0 %v2217_v55 }
  0x50   : > { %1036 = vmatprep.mubr.bf16.mxu1 %v2219_v56 }
  0x56   : > { %940 = vmatmul.mubr.bf16.gmra.mxu0 %v2221_v57  ;;  %v1066_v57 = vld [vmem:[%s2530_s21 + $0x20] sm:$0xff] }
  0x57   : > { %1037 = vmatmul.mubr.bf16.gmra.mxu1 %v2222_v58  ;;  %947 = vmatprep.mubr.bf16.mxu0 %v2223_v59  ;;  %v1067_v59 = vld [vmem:[%s2530_s21 + $0x28] sm:$0xff] }
  0x58   : > { %1044 = vmatprep.mubr.bf16.mxu1 %v2225_v60  ;;  %v1084_v3 = vmul.f32 %v2533_v16, %v1067_v59  ;;  %v1073_v59 = vld [vmem:[%s2530_s21 + $0x58] sm:$0xff] }
  0x5e   : > { %948 = vmatmul.mubr.bf16.gmra.mxu0 %v2227_v61 }
  0x5f   : > { %1045 = vmatmul.mubr.bf16.gmra.mxu1 %v2228_v62  ;;  %955 = vmatprep.mubr.bf16.mxu0 %v2229_v63 }
  0x60   : > { %1052 = vmatprep.mubr.bf16.mxu1 %v2231_v0 }
  0x66   : > { %956 = vmatmul.mubr.bf16.gmra.mxu0 %v2233_v1  ;;  %v1083_v1 = vmul.f32 %v2533_v16, %v1066_v57  ;;  %v1072_v57 = vld [vmem:[%s2530_s21 + $0x50] sm:$0xff] }
  0x67   : > { %1053 = vmatmul.mubr.bf16.gmra.mxu1 %v2234_v2 }
  0xee   : > { %v1939_v8 = vpop.f32.mrf.mxu0 }
  0xef   : > { %v2003_v9 = vpop.f32.mrf.mxu1 }
  0xf0   : > { %v1940_v10 = vpop.f32.mrf.mxu0 }
  0xf1   : > { %v2004_v11 = vpop.f32.mrf.mxu1  ;;  %v1941_v12 = vadd.f32 %v1940_v10, %v1939_v8 }
  0xf2   : > { %v2005_v13 = vadd.f32 %v2004_v11, %v2003_v9  ;;  %v1942_v14 = vpop.f32.mrf.mxu0 }
  0xf3   : > { %v2006_v17 = vpop.f32.mrf.mxu1 }
  0xf4   : > { %v1943_v19 = vpop.f32.mrf.mxu0  ;;  %v999_v22 = vadd.f32 %v2005_v13, %v1941_v12 }
  0xf5   : > { %v1944_v20 = vadd.f32 %v1943_v19, %v1942_v14  ;;  %v2007_v21 = vpop.f32.mrf.mxu1  ;;  %v1068_v14 = vld [vmem:[%s2530_s21 + $0x30] sm:$0xff] }
  0xf6   : > { %v2008_v24 = vadd.f32 %v2007_v21, %v2006_v17  ;;  %v1945_v26 = vpop.f32.mrf.mxu0  ;;  %v1095_v31 = vadd.f32 %v1079_v23, %v999_v22  ;;  %v1069_v17 = vld [vmem:[%s2530_s21 + $0x38] sm:$0xff]  ;;  %v1085_v23 = vmul.f32 %v2533_v16, %v1068_v14  ;;  %v1074_v14 = vld [vmem:[%s2530_s21 + $0x60] sm:$0xff] }
  0xf7   : > { %v2009_v27 = vpop.f32.mrf.mxu1 }
  0xf8   : > { %v1002_v28 = vadd.f32 %v2008_v24, %v1944_v20  ;;  %v1946_v29 = vpop.f32.mrf.mxu0 }
  0xf9   : > { %v2010_v30 = vpop.f32.mrf.mxu1  ;;  %v1947_v33 = vadd.f32 %v1946_v29, %v1945_v26 }
  0xfa   : > { %v1096_v32 = vadd.f32 %v1080_v25, %v1002_v28  ;;  %v2011_v34 = vadd.f32 %v2010_v30, %v2009_v27  ;;  %v1948_v35 = vpop.f32.mrf.mxu0  ;;  %v1086_v25 = vmul.f32 %v2533_v16, %v1069_v17  ;;  %v1075_v17 = vld [vmem:[%s2530_s21 + $0x68] sm:$0xff] }
  0xfb   : > { %v2012_v37 = vpop.f32.mrf.mxu1 }
  0xfc   : > { %v1949_v39 = vpop.f32.mrf.mxu0  ;;  %v1111_v40 = vpack.c.bf16 %v1096_v32, %v1095_v31  ;;  %v1007_v43 = vadd.f32 %v2011_v34, %v1947_v33 }
  0xfd   : > { %v1950_v41 = vadd.f32 %v1949_v39, %v1948_v35  ;;  %v2013_v42 = vpop.f32.mrf.mxu1 }
  0xfe   : > { %v2014_v45 = vadd.f32 %v2013_v42, %v2012_v37  ;;  %2099 = vmatprep.mubr.bf16.mxu0 %v1111_v40  ;;  %v1951_v47 = vpop.f32.mrf.mxu0  ;;  %v1097_v52 = vadd.f32 %v1081_v44, %v1007_v43  ;;  %v1087_v44 = vmul.f32 %v2533_v16, %v1070_v36  ;;  %v1076_v36 = vld [vmem:[%s2530_s21 + $0x70] sm:$0xff] }
  0xff   : > { %v2015_v48 = vpop.f32.mrf.mxu1 }
 0x100   : > { %v1010_v49 = vadd.f32 %v2014_v45, %v1950_v41  ;;  %v1952_v50 = vpop.f32.mrf.mxu0 }
 0x101   : > { %v2016_v51 = vpop.f32.mrf.mxu1  ;;  %v1953_v54 = vadd.f32 %v1952_v50, %v1951_v47 }
 0x102   : > { %v1098_v53 = vadd.f32 %v1082_v46, %v1010_v49  ;;  %v2017_v55 = vadd.f32 %v2016_v51, %v2015_v48  ;;  %v1954_v56 = vpop.f32.mrf.mxu0  ;;  %v1088_v46 = vmul.f32 %v2533_v16, %v1071_v38  ;;  %v1077_v38 = vld [vmem:[%s2530_s21 + $0x78] sm:$0xff] }
 0x103   : > { %v2018_v58 = vpop.f32.mrf.mxu1 }
 0x104   : > { %v1112_v60 = vpack.c.bf16 %v1098_v53, %v1097_v52  ;;  %v1955_v61 = vpop.f32.mrf.mxu0  ;;  %v1015_v0 = vadd.f32 %v2017_v55, %v1953_v54 }
 0x105   : > { %v1956_v62 = vadd.f32 %v1955_v61, %v1954_v56  ;;  %v2019_v63 = vpop.f32.mrf.mxu1 }
 0x106   : > { %v2020_v2 = vadd.f32 %v2019_v63, %v2018_v58  ;;  %2100 = vmatmul.mubr.bf16.vlgmr.msra.gmra.mxu0 %v1112_v60  ;;  %v1957_v4 = vpop.f32.mrf.mxu0  ;;  %v1099_v9 = vadd.f32 %v1083_v1, %v1015_v0  ;;  %v1089_v1 = vmul.f32 %v2533_v16, %v1072_v57 }
 0x107   : > { %v2021_v5 = vpop.f32.mrf.mxu1 }
 0x108   : > { %v1018_v6 = vadd.f32 %v2020_v2, %v1956_v62  ;;  %v1958_v7 = vpop.f32.mrf.mxu0 }
 0x109   : > { %v2022_v8 = vpop.f32.mrf.mxu1  ;;  %v1959_v11 = vadd.f32 %v1958_v7, %v1957_v4 }
 0x10a   : > { %v1100_v10 = vadd.f32 %v1084_v3, %v1018_v6  ;;  %v2023_v12 = vadd.f32 %v2022_v8, %v2021_v5  ;;  %v1960_v13 = vpop.f32.mrf.mxu0  ;;  %v1090_v3 = vmul.f32 %v2533_v16, %v1073_v59 }
 0x10b   : > { %v2024_v15 = vpop.f32.mrf.mxu1 }
 0x10c   : > { %v1961_v18 = vpop.f32.mrf.mxu0  ;;  %v1113_v19 = vpack.c.bf16 %v1100_v10, %v1099_v9  ;;  %v1023_v22 = vadd.f32 %v2023_v12, %v1959_v11 }
 0x10d   : > { %v1962_v20 = vadd.f32 %v1961_v18, %v1960_v13  ;;  %v2025_v21 = vpop.f32.mrf.mxu1 }
 0x10e   : > { %v2026_v24 = vadd.f32 %v2025_v21, %v2024_v15  ;;  %2103 = vmatprep.mubr.bf16.mxu0 %v1113_v19  ;;  %v1963_v26 = vpop.f32.mrf.mxu0  ;;  %v1101_v31 = vadd.f32 %v1085_v23, %v1023_v22  ;;  %v1091_v23 = vmul.f32 %v2533_v16, %v1074_v14 }
 0x10f   : > { %v2027_v27 = vpop.f32.mrf.mxu1 }
 0x110   : > { %v1026_v28 = vadd.f32 %v2026_v24, %v1962_v20  ;;  %v1964_v29 = vpop.f32.mrf.mxu0 }
 0x111   : > { %v2028_v30 = vpop.f32.mrf.mxu1  ;;  %v1965_v33 = vadd.f32 %v1964_v29, %v1963_v26 }
 0x112   : > { %v1102_v32 = vadd.f32 %v1086_v25, %v1026_v28  ;;  %v2029_v34 = vadd.f32 %v2028_v30, %v2027_v27  ;;  %v1966_v35 = vpop.f32.mrf.mxu0  ;;  %v1092_v25 = vmul.f32 %v2533_v16, %v1075_v17 }
 0x113   : > { %v2030_v37 = vpop.f32.mrf.mxu1 }
 0x114   : > { %v1967_v39 = vpop.f32.mrf.mxu0  ;;  %v1114_v40 = vpack.c.bf16 %v1102_v32, %v1101_v31  ;;  %v1031_v43 = vadd.f32 %v2029_v34, %v1965_v33 }
 0x115   : > { %v1968_v41 = vadd.f32 %v1967_v39, %v1966_v35  ;;  %v2031_v42 = vpop.f32.mrf.mxu1 }
 0x116   : > { %v2032_v45 = vadd.f32 %v2031_v42, %v2030_v37  ;;  %2104 = vmatmul.mubr.bf16.gmra.mxu0 %v1114_v40  ;;  %v1969_v47 = vpop.f32.mrf.mxu0  ;;  %v1103_v52 = vadd.f32 %v1087_v44, %v1031_v43  ;;  %v1093_v44 = vmul.f32 %v2533_v16, %v1076_v36 }
 0x117   : > { %v2033_v48 = vpop.f32.mrf.mxu1 }
 0x118   : > { %v1034_v49 = vadd.f32 %v2032_v45, %v1968_v41  ;;  %v1970_v50 = vpop.f32.mrf.mxu0 }
 0x119   : > { %v2034_v51 = vpop.f32.mrf.mxu1  ;;  %v1971_v54 = vadd.f32 %v1970_v50, %v1969_v47 }
 0x11a   : > { %v1104_v53 = vadd.f32 %v1088_v46, %v1034_v49  ;;  %v2035_v55 = vadd.f32 %v2034_v51, %v2033_v48  ;;  %v1972_v56 = vpop.f32.mrf.mxu0  ;;  %v1094_v46 = vmul.f32 %v2533_v16, %v1077_v38  ;;  %v1899_v51 = vld [vmem:[%s2850_s5] ss:$0 sm:$0xff] }
 0x11b   : > { %v2036_v58 = vpop.f32.mrf.mxu1 }
 0x11c   : > { %v1973_v60 = vpop.f32.mrf.mxu0  ;;  %v1115_v61 = vpack.c.bf16 %v1104_v53, %v1103_v52  ;;  %v1039_v0 = vadd.f32 %v2035_v55, %v1971_v54  ;;  %v2572_v53 = vld [vmem:[%s2851_s6] ss:$0 sm:$0xff] }
 0x11d   : > { %v1974_v62 = vadd.f32 %v1973_v60, %v1972_v56  ;;  %v2037_v63 = vpop.f32.mrf.mxu1 }
 0x11e   : > { %v2038_v2 = vadd.f32 %v2037_v63, %v2036_v58  ;;  %2107 = vmatprep.mubr.bf16.mxu0 %v1115_v61  ;;  %v1975_v4 = vpop.f32.mrf.mxu0  ;;  %v1105_v9 = vadd.f32 %v1089_v1, %v1039_v0 }
 0x11f   : > { %v2039_v5 = vpop.f32.mrf.mxu1 }
 0x120   : > { %v1042_v6 = vadd.f32 %v2038_v2, %v1974_v62  ;;  %v1976_v7 = vpop.f32.mrf.mxu0 }
 0x121   : > { %v2040_v8 = vpop.f32.mrf.mxu1  ;;  %v1977_v11 = vadd.f32 %v1976_v7, %v1975_v4 }
 0x122   : > { %v1106_v10 = vadd.f32 %v1090_v3, %v1042_v6  ;;  %v2041_v12 = vadd.f32 %v2040_v8, %v2039_v5  ;;  %v1978_v13 = vpop.f32.mrf.mxu0 }
 0x123   : > { %v2042_v15 = vpop.f32.mrf.mxu1 }
 0x124   : > { %v1979_v18 = vpop.f32.mrf.mxu0  ;;  %v1116_v19 = vpack.c.bf16 %v1106_v10, %v1105_v9  ;;  %v1047_v22 = vadd.f32 %v2041_v12, %v1977_v11 }
 0x125   : > { %v1980_v20 = vadd.f32 %v1979_v18, %v1978_v13  ;;  %v2043_v21 = vpop.f32.mrf.mxu1 }
 0x126   : > { %v2044_v24 = vadd.f32 %v2043_v21, %v2042_v15  ;;  %2108 = vmatmul.mubr.bf16.gmra.mxu0 %v1116_v19  ;;  %v1981_v26 = vpop.f32.mrf.mxu0  ;;  %v1107_v31 = vadd.f32 %v1091_v23, %v1047_v22 }
 0x127   : > { %v2045_v27 = vpop.f32.mrf.mxu1 }
 0x128   : > { %v1050_v28 = vadd.f32 %v2044_v24, %v1980_v20  ;;  %v1982_v29 = vpop.f32.mrf.mxu0 }
 0x129   : > { %v2046_v30 = vpop.f32.mrf.mxu1  ;;  %v1983_v33 = vadd.f32 %v1982_v29, %v1981_v26 }
 0x12a   : > { %v1108_v32 = vadd.f32 %v1092_v25, %v1050_v28  ;;  %v2047_v34 = vadd.f32 %v2046_v30, %v2045_v27  ;;  %v1984_v35 = vpop.f32.mrf.mxu0 }
 0x12b   : > { %v2048_v37 = vpop.f32.mrf.mxu1 }
 0x12c   : > { %v1985_v39 = vpop.f32.mrf.mxu0  ;;  %v1117_v40 = vpack.c.bf16 %v1108_v32, %v1107_v31  ;;  %v1055_v43 = vadd.f32 %v2047_v34, %v1983_v33 }
 0x12d   : > { %v1986_v41 = vadd.f32 %v1985_v39, %v1984_v35  ;;  %v2049_v42 = vpop.f32.mrf.mxu1 }
 0x12e   : > { %v2050_v45 = vadd.f32 %v2049_v42, %v2048_v37  ;;  %2111 = vmatprep.mubr.bf16.mxu0 %v1117_v40  ;;  %v1109_v48 = vadd.f32 %v1093_v44, %v1055_v43  ;;  %v2243_v37 = vld [vmem:[%s2854_s9 + $0x38] sm:$0xff]  }
 0x12f   : > { %2115 = vmatprep.subr.bf16.mxu1 %v2243_v37 }
 0x130   : > { %v1058_v47 = vadd.f32 %v2050_v45, %v1986_v41  ;;  %2116 = vmatpush3.bf16.msra.mxu1 %v2243_v37 }
 0x132   : > { %v1110_v49 = vadd.f32 %v1094_v46, %v1058_v47 }
 0x134   : > { %v1118_v50 = vpack.c.bf16 %v1110_v49, %v1109_v48 }
 0x136   : > { %2112 = vmatmul.mubr.bf16.gmra.mxu0 %v1118_v50 }
 0x1c6   : > { %v2101_v52 = vpop.f32.mrf.mxu0 }
 0x1c7   : > { %v1233_v54 = vadd.f32 %v2101_v52, %v1899_v51 }
 0x1c8   : > { %v1224_v55 = vpop.f32.mrf.mxu0 }
 0x1c9   : > { %v1225_v56 = vadd.f32 %v1899_v51, %v1224_v55  ;;  %v2575_v16 = vmul.f32 %v2572_v53, %v1233_v54 }
 0x1ca   : > { %v2102_v57 = vpop.f32.mrf.mxu0 }
 0x1cb   : > { %v1236_v58 = vadd.f32 %v2102_v57, %v1899_v51  ;;  %1313 = vadd.xlane.f32.xlu1 %v2575_v16  ;;  %v2579_v59 = vmul.f32 %v2572_v53, %v1225_v56 }
 0x1cc   : > { %v1227_v60 = vpop.f32.mrf.mxu0 }
 0x1cd   : > { %v1228_v61 = vadd.f32 %v1899_v51, %v1227_v60  ;;  %1309 = vadd.xlane.f32.xlu0 %v2579_v59  ;;  %v2583_v62 = vmul.f32 %v2572_v53, %v1236_v58 }
 0x1cf   : > { %1315 = vadd.xlane.f32.xlu1 %v2583_v62  ;;  %v2587_v63 = vmul.f32 %v2572_v53, %v1228_v61 }
 0x1d1   : > { %1311 = vadd.xlane.f32.xlu0 %v2587_v63 }
 0x1d6   : > { %v2105_v0 = vpop.f32.mrf.mxu0 }
 0x1d7   : > { %v1249_v4 = vadd.f32 %v2105_v0, %v1899_v51 }
 0x1d8   : > { %v1240_v1 = vpop.f32.mrf.mxu0 }
 0x1d9   : > { %v1241_v2 = vadd.f32 %v1899_v51, %v1240_v1  ;;  %v2598_v10 = vmul.f32 %v2572_v53, %v1249_v4 }
 0x1da   : > { %v2106_v3 = vpop.f32.mrf.mxu0 }
 0x1db   : > { %v2591_v5 = vmul.f32 %v2572_v53, %v1241_v2  ;;  %v1252_v8 = vadd.f32 %v2106_v3, %v1899_v51 }
 0x1dc   : > { %v1243_v6 = vpop.f32.mrf.mxu0 }
 0x1dd   : > { %v1244_v7 = vadd.f32 %v1899_v51, %v1243_v6  ;;  %1317 = vadd.xlane.f32.xlu0 %v2591_v5  ;;  %v2603_v11 = vmul.f32 %v2572_v53, %v1252_v8  ;;  %v2244_v6 = vld [vmem:[%s2854_s9 + $0x30] sm:$0xff]  }
 0x1de   : > { %2117 = vmatprep.subr.bf16.mxu1 %v2244_v6 }
 0x1df   : > { %v2595_v9 = vmul.f32 %v2572_v53, %v1244_v7  ;;  %2118 = vmatpush3.bf16.msra.mxu1 %v2244_v6 }
 0x1e1   : > { %1319 = vadd.xlane.f32.xlu1 %v2595_v9  ;;  %1321 = vadd.xlane.f32.xlu0 %v2598_v10 }
 0x1e5   : > { %1323 = vadd.xlane.f32.xlu1 %v2603_v11 }
 0x1e6   : > { %v2109_v12 = vpop.f32.mrf.mxu0 }
 0x1e7   : > { %v1265_v17 = vadd.f32 %v2109_v12, %v1899_v51 }
 0x1e8   : > { %v1256_v13 = vpop.f32.mrf.mxu0 }
 0x1e9   : > { %v1257_v14 = vadd.f32 %v1899_v51, %v1256_v13  ;;  %v2614_v23 = vmul.f32 %v2572_v53, %v1265_v17 }
 0x1ea   : > { %v2110_v15 = vpop.f32.mrf.mxu0 }
 0x1eb   : > { %v2607_v18 = vmul.f32 %v2572_v53, %v1257_v14  ;;  %v1268_v21 = vadd.f32 %v2110_v15, %v1899_v51  ;;  %v2245_v15 = vld [vmem:[%s2854_s9 + $0x28] sm:$0xff]  }
 0x1ec   : > { %v1259_v19 = vpop.f32.mrf.mxu0  ;;  %2119 = vmatprep.subr.bf16.mxu1 %v2245_v15 }
 0x1ed   : > { %v1260_v20 = vadd.f32 %v1899_v51, %v1259_v19  ;;  %1325 = vadd.xlane.f32.xlu0 %v2607_v18  ;;  %v2619_v24 = vmul.f32 %v2572_v53, %v1268_v21  ;;  %2120 = vmatpush3.bf16.msra.mxu1 %v2245_v15 }
 0x1ef   : > { %v2611_v22 = vmul.f32 %v2572_v53, %v1260_v20  ;;  %v2246_v20 = vld [vmem:[%s2854_s9 + $0x20] sm:$0xff]  }
 0x1f0   : > { %2121 = vmatprep.subr.bf16.mxu1 %v2246_v20 }
 0x1f1   : > { %1327 = vadd.xlane.f32.xlu1 %v2611_v22  ;;  %1329 = vadd.xlane.f32.xlu0 %v2614_v23 }
 0x1f2   : > { %2122 = vmatpush3.bf16.msra.mxu1 %v2246_v20 }
 0x1f5   : > { %1331 = vadd.xlane.f32.xlu1 %v2619_v24 }
 0x1f6   : > { %v2113_v25 = vpop.f32.mrf.mxu0 }
 0x1f7   : > { %v1281_v29 = vadd.f32 %v2113_v25, %v1899_v51 }
 0x1f8   : > { %v1272_v26 = vpop.f32.mrf.mxu0 }
 0x1f9   : > { %v1273_v27 = vadd.f32 %v1899_v51, %v1272_v26  ;;  %v2630_v35 = vmul.f32 %v2572_v53, %v1281_v29 }
 0x1fa   : > { %v2114_v28 = vpop.f32.mrf.mxu0 }
 0x1fb   : > { %v2623_v30 = vmul.f32 %v2572_v53, %v1273_v27  ;;  %v1284_v33 = vadd.f32 %v2114_v28, %v1899_v51 }
 0x1fc   : > { %v1275_v31 = vpop.f32.mrf.mxu0 }
 0x1fd   : > { %v1276_v32 = vadd.f32 %v1899_v51, %v1275_v31  ;;  %1333 = vadd.xlane.f32.xlu0 %v2623_v30  ;;  %v2635_v36 = vmul.f32 %v2572_v53, %v1284_v33  ;;  %v2247_v31 = vld [vmem:[%s2854_s9 + $0x18] sm:$0xff]  }
 0x1fe   : > { %2123 = vmatprep.subr.bf16.mxu1 %v2247_v31 }
 0x1ff   : > { %v2627_v34 = vmul.f32 %v2572_v53, %v1276_v32  ;;  %2124 = vmatpush3.bf16.msra.mxu1 %v2247_v31 }
 0x201   : > { %1335 = vadd.xlane.f32.xlu1 %v2627_v34  ;;  %1337 = vadd.xlane.f32.xlu0 %v2630_v35 }
 0x205   : > { %1339 = vadd.xlane.f32.xlu1 %v2635_v36 }
 0x254   : > { %v1314_v38 = vpop.xlane.xlu1 %1313 }
 0x255   : > { %v1343_v39 = vmul.f32 0.03125, %v1314_v38 }
 0x256   : > { %v1310_v40 = vpop.xlane.xlu0 %1309 }
 0x257   : > { %v1341_v41 = vmul.f32 0.03125, %v1310_v40  ;;  %v1359_v43 = vsub.f32 %v2575_v16, %v1343_v39 }
 0x258   : > { %v1316_v42 = vpop.xlane.xlu1 %1315 }
 0x259   : > { %v1357_v44 = vsub.f32 %v2579_v59, %v1341_v41  ;;  %v1344_v45 = vmul.f32 0.03125, %v1316_v42  ;;  %v2651_v52 = vmul.f32 %v2572_v53, %v1359_v43 }
 0x25a   : > { %v1312_v46 = vpop.xlane.xlu0 %1311 }
 0x25b   : > { %v1342_v47 = vmul.f32 0.03125, %v1312_v46  ;;  %v2644_v48 = vmul.f32 %v2572_v53, %v1357_v44  ;;  %v1360_v49 = vsub.f32 %v2583_v62, %v1344_v45  ;;  %v1391_v55 = vmul.f32 %v2651_v52, %v2651_v52  ;;  %v2249_v44 = vld [vmem:[%s2854_s9 + $0x8] sm:$0xff]  }
 0x25d   : > { %v1358_v50 = vsub.f32 %v2587_v63, %v1342_v47  ;;  %v1389_v51 = vmul.f32 %v2644_v48, %v2644_v48  ;;  %v2661_v16 = vmul.f32 %v2572_v53, %v1360_v49  ;;  %v2250_v47 = vld [vmem:[%s2854_s9] sm:$0xff]  }
 0x25f   : > { %1405 = vadd.xlane.f32.xlu0 %v1389_v51  ;;  %v2654_v54 = vmul.f32 %v2572_v53, %v1358_v50  ;;  %v1392_v57 = vmul.f32 %v2661_v16, %v2661_v16 }
 0x261   : > { %v1390_v56 = vmul.f32 %v2654_v54, %v2654_v54 }
 0x263   : > { %1409 = vadd.xlane.f32.xlu0 %v1391_v55  ;;  %1407 = vadd.xlane.f32.xlu1 %v1390_v56 }
 0x266   : > { %v1318_v58 = vpop.xlane.xlu0 %1317 }
 0x267   : > { %v1345_v59 = vmul.f32 0.03125, %v1318_v58  ;;  %1411 = vadd.xlane.f32.xlu1 %v1392_v57 }
 0x269   : > { %v1361_v60 = vsub.f32 %v2591_v5, %v1345_v59 }
 0x26a   : > { %v1320_v61 = vpop.xlane.xlu1 %1319  ;;  %v1322_v62 = vpop.xlane.xlu0 %1321 }
 0x26b   : > { %v1346_v63 = vmul.f32 0.03125, %v1320_v61  ;;  %v1347_v0 = vmul.f32 0.03125, %v1322_v62  ;;  %v2667_v1 = vmul.f32 %v2572_v53, %v1361_v60 }
 0x26d   : > { %v1362_v2 = vsub.f32 %v2595_v9, %v1346_v63  ;;  %v1363_v3 = vsub.f32 %v2598_v10, %v1347_v0  ;;  %v1393_v4 = vmul.f32 %v2667_v1, %v2667_v1 }
 0x26e   : > { %v1324_v7 = vpop.xlane.xlu1 %1323 }
 0x26f   : > { %v1348_v5 = vmul.f32 0.03125, %v1324_v7  ;;  %1413 = vadd.xlane.f32.xlu0 %v1393_v4  ;;  %v2677_v8 = vmul.f32 %v2572_v53, %v1362_v2  ;;  %v2680_v12 = vmul.f32 %v2572_v53, %v1363_v3 }
 0x271   : > { %v1364_v9 = vsub.f32 %v2603_v11, %v1348_v5  ;;  %v1394_v10 = vmul.f32 %v2677_v8, %v2677_v8  ;;  %v1395_v13 = vmul.f32 %v2680_v12, %v2680_v12 }
 0x273   : > { %1415 = vadd.xlane.f32.xlu1 %v1394_v10  ;;  %1417 = vadd.xlane.f32.xlu0 %v1395_v13  ;;  %v2688_v14 = vmul.f32 %v2572_v53, %v1364_v9 }
 0x275   : > { %v1396_v17 = vmul.f32 %v2688_v14, %v2688_v14 }
 0x276   : > { %v1326_v19 = vpop.xlane.xlu0 %1325 }
 0x277   : > { %v1349_v11 = vmul.f32 0.03125, %v1326_v19  ;;  %1419 = vadd.xlane.f32.xlu1 %v1396_v17 }
 0x279   : > { %v1365_v21 = vsub.f32 %v2607_v18, %v1349_v11 }
 0x27a   : > { %v1328_v25 = vpop.xlane.xlu1 %1327  ;;  %v1330_v26 = vpop.xlane.xlu0 %1329 }
 0x27b   : > { %v1350_v27 = vmul.f32 0.03125, %v1328_v25  ;;  %v1351_v28 = vmul.f32 0.03125, %v1330_v26  ;;  %v2700_v29 = vmul.f32 %v2572_v53, %v1365_v21  ;;  %v2761_v25 = vld [vmem:[%s2852_s7] ss:$0 sm:$0xff] }
 0x27d   : > { %v1366_v32 = vsub.f32 %v2611_v22, %v1350_v27  ;;  %v1367_v33 = vsub.f32 %v2614_v23, %v1351_v28  ;;  %v1397_v18 = vmul.f32 %v2700_v29, %v2700_v29  ;;  %v2248_v22 = vld [vmem:[%s2854_s9 + $0x10] sm:$0xff]  }
 0x27e   : > { %v1332_v37 = vpop.xlane.xlu1 %1331  ;;  %2125 = vmatprep.subr.bf16.mxu1 %v2248_v22 }
 0x27f   : > { %v1352_v38 = vmul.f32 0.03125, %v1332_v37  ;;  %1421 = vadd.xlane.f32.xlu0 %v1397_v18  ;;  %v2710_v39 = vmul.f32 %v2572_v53, %v1366_v32  ;;  %v2713_v40 = vmul.f32 %v2572_v53, %v1367_v33  ;;  %2126 = vmatpush3.bf16.msra.mxu1 %v2248_v22  ;;  %v2768_v37 = vld [vmem:[%s2853_s8] ss:$0 sm:$0xff] }
 0x280   : > { %2127 = vmatprep.subr.bf16.mxu1 %v2249_v44 }
 0x281   : > { %v1368_v23 = vsub.f32 %v2619_v24, %v1352_v38  ;;  %v1398_v41 = vmul.f32 %v2710_v39, %v2710_v39  ;;  %v1399_v42 = vmul.f32 %v2713_v40, %v2713_v40 }
 0x283   : > { %1423 = vadd.xlane.f32.xlu1 %v1398_v41  ;;  %1425 = vadd.xlane.f32.xlu0 %v1399_v42  ;;  %v2724_v43 = vmul.f32 %v2572_v53, %v1368_v23 }
 0x284   : > { %2128 = vmatpush3.bf16.msra.mxu1 %v2249_v44 }
 0x285   : > { %v1400_v24 = vmul.f32 %v2724_v43, %v2724_v43  ;;  %2129 = vmatprep.subr.bf16.mxu1 %v2250_v47 }
 0x286   : > { %v1334_v45 = vpop.xlane.xlu0 %1333 }
 0x287   : > { %v1353_v46 = vmul.f32 0.03125, %v1334_v45  ;;  %1427 = vadd.xlane.f32.xlu1 %v1400_v24 }
 0x288   : > { %2130 = vmatpush3.bf16.msra.mxu1 %v2250_v47 }
 0x289   : > { %v1369_v49 = vsub.f32 %v2623_v30, %v1353_v46 }
 0x28a   : > { %v1336_v50 = vpop.xlane.xlu1 %1335  ;;  %v1338_v51 = vpop.xlane.xlu0 %1337 }
 0x28b   : > { %v1354_v55 = vmul.f32 0.03125, %v1336_v50  ;;  %v1355_v56 = vmul.f32 0.03125, %v1338_v51  ;;  %v2736_v57 = vmul.f32 %v2572_v53, %v1369_v49 }
 0x28d   : > { %v1370_v58 = vsub.f32 %v2627_v34, %v1354_v55  ;;  %v1371_v59 = vsub.f32 %v2630_v35, %v1355_v56  ;;  %v1401_v60 = vmul.f32 %v2736_v57, %v2736_v57 }
 0x28e   : > { %v1340_v61 = vpop.xlane.xlu1 %1339 }
 0x28f   : > { %v1356_v62 = vmul.f32 0.03125, %v1340_v61  ;;  %1429 = vadd.xlane.f32.xlu0 %v1401_v60  ;;  %v2743_v30 = vmul.f32 %v2572_v53, %v1370_v58  ;;  %v2746_v63 = vmul.f32 %v2572_v53, %v1371_v59 }
 0x291   : > { %v1372_v0 = vsub.f32 %v2635_v36, %v1356_v62  ;;  %v1402_v2 = vmul.f32 %v2743_v30, %v2743_v30  ;;  %v1403_v34 = vmul.f32 %v2746_v63, %v2746_v63 }
 0x293   : > { %1431 = vadd.xlane.f32.xlu1 %v1402_v2  ;;  %1433 = vadd.xlane.f32.xlu0 %v1403_v34  ;;  %v2754_v35 = vmul.f32 %v2572_v53, %v1372_v0 }
 0x295   : > { %v1404_v3 = vmul.f32 %v2754_v35, %v2754_v35 }
 0x297   : > { %1435 = vadd.xlane.f32.xlu1 %v1404_v3 }
 0x2e8   : > { %v1406_v4 = vpop.xlane.xlu0 %1405 }
 0x2e9   : > { %v1437_v6 = vmul.f32 0.03125, %v1406_v4 }
 0x2eb   : > { %v1453_v7 = vadd.f32 1e-05, %v1437_v6 }
 0x2ec   : > { %v1408_v5 = vpop.xlane.xlu1 %1407  ;;  %v1410_v36 = vpop.xlane.xlu0 %1409 }
 0x2ed   : > { %2251 = vrsqrt.f32 %v1453_v7  ;;  %v1438_v9 = vmul.f32 0.03125, %v1408_v5  ;;  %v1439_v10 = vmul.f32 0.03125, %v1410_v36 }
 0x2ef   : > { %v1454_v13 = vadd.f32 1e-05, %v1438_v9  ;;  %v1455_v15 = vadd.f32 1e-05, %v1439_v10 }
 0x2f0   : > { %v1412_v17 = vpop.xlane.xlu1 %1411 }
 0x2f1   : > { %2253 = vrsqrt.f32 %v1454_v13  ;;  %v1440_v19 = vmul.f32 0.03125, %v1412_v17 }
 0x2f2   : > { %2255 = vrsqrt.f32 %v1455_v15 }
 0x2f3   : > { %v1456_v53 = vadd.f32 1e-05, %v1440_v19 }
 0x2f5   : > { %2257 = vrsqrt.f32 %v1456_v53 }
 0x2f8   : > { %v1414_v11 = vpop.xlane.xlu0 %1413 }
 0x2f9   : > { %v1441_v20 = vmul.f32 0.03125, %v1414_v11 }
 0x2fa   : > { %v2252_v21 = vpop.eup %2251 }
 0x2fb   : > { %v1457_v26 = vadd.f32 1e-05, %v1441_v20  ;;  %v1485_v27 = vmul.f32 %v2252_v21, %v2644_v48 }
 0x2fc   : > { %v1416_v28 = vpop.xlane.xlu1 %1415  ;;  %v1418_v31 = vpop.xlane.xlu0 %1417 }
 0x2fd   : > { %2259 = vrsqrt.f32 %v1457_v26  ;;  %v1442_v32 = vmul.f32 0.03125, %v1416_v28  ;;  %v1443_v33 = vmul.f32 0.03125, %v1418_v31  ;;  %v1508_v18 = vmul.f32 %v2761_v25, %v1485_v27 }
 0x2fe   : > { %v2254_v38 = vpop.eup %2253 }
 0x2ff   : > { %v2256_v22 = vpop.eup %2255  ;;  %v1458_v23 = vadd.f32 1e-05, %v1442_v32  ;;  %v1459_v41 = vadd.f32 1e-05, %v1443_v33  ;;  %v1486_v42 = vmul.f32 %v2254_v38, %v2654_v54  ;;  %v1531_v24 = vadd.f32 %v2768_v37, %v1508_v18 }
 0x300   : > { %v1487_v48 = vmul.f32 %v2256_v22, %v2651_v52  ;;  %v1420_v44 = vpop.xlane.xlu1 %1419 }
 0x301   : > { %2261 = vrsqrt.f32 %v1458_v23  ;;  %v1444_v45 = vmul.f32 0.03125, %v1420_v44  ;;  %v1509_v46 = vmul.f32 %v2761_v25, %v1486_v42  ;;  %v1547_v56 = vmax.f32 %v1531_v24, 0.0 }
 0x302   : > { %v2258_v47 = vpop.eup %2257  ;;  %2263 = vrsqrt.f32 %v1459_v41  ;;  %v1510_v49 = vmul.f32 %v2761_v25, %v1487_v48 }
 0x303   : > { %v1488_v50 = vmul.f32 %v2258_v47, %v2661_v16  ;;  %v1460_v51 = vadd.f32 1e-05, %v1444_v45  ;;  %v1532_v55 = vadd.f32 %v2768_v37, %v1509_v46 }
 0x304   : > { %v1533_v58 = vadd.f32 %v2768_v37, %v1510_v49 }
 0x305   : > { %2265 = vrsqrt.f32 %v1460_v51  ;;  %v1548_v54 = vmax.f32 %v1532_v55, 0.0  ;;  %v1511_v52 = vmul.f32 %v2761_v25, %v1488_v50 }
 0x306   : > { %v1549_v0 = vmax.f32 %v1533_v58, 0.0 }
 0x307   : > { %v1563_v59 = vpack.c.bf16 %v1548_v54, %v1547_v56  ;;  %v1534_v60 = vadd.f32 %v2768_v37, %v1511_v52 }
 0x308   : > { %v1422_v61 = vpop.xlane.xlu0 %1421 }
 0x309   : > { %v1445_v62 = vmul.f32 0.03125, %v1422_v61  ;;  %2131 = vmatprep.mubr.bf16.mxu1 %v1563_v59  ;;  %v1550_v2 = vmax.f32 %v1534_v60, 0.0 }
 0x30a   : > { %v2260_v34 = vpop.eup %2259 }
 0x30b   : > { %v1461_v16 = vadd.f32 1e-05, %v1445_v62  ;;  %v1564_v3 = vpack.c.bf16 %v1550_v2, %v1549_v0  ;;  %v1489_v4 = vmul.f32 %v2260_v34, %v2667_v1 }
 0x30c   : > { %v1424_v6 = vpop.xlane.xlu1 %1423  ;;  %v1426_v7 = vpop.xlane.xlu0 %1425 }
 0x30d   : > { %2267 = vrsqrt.f32 %v1461_v16  ;;  %v1446_v5 = vmul.f32 0.03125, %v1424_v6  ;;  %v1447_v36 = vmul.f32 0.03125, %v1426_v7  ;;  %2132 = vmatmul.mubr.bf16.vlgmr.msra.gmra.mxu1 %v1564_v3  ;;  %v1512_v9 = vmul.f32 %v2761_v25, %v1489_v4 }
 0x30e   : > { %v2262_v10 = vpop.eup %2261 }
 0x30f   : > { %v2264_v13 = vpop.eup %2263  ;;  %v1462_v15 = vadd.f32 1e-05, %v1446_v5  ;;  %v1463_v17 = vadd.f32 1e-05, %v1447_v36  ;;  %v1490_v19 = vmul.f32 %v2262_v10, %v2677_v8  ;;  %v1535_v11 = vadd.f32 %v2768_v37, %v1512_v9 }
 0x310   : > { %v1428_v53 = vpop.xlane.xlu1 %1427  ;;  %v1491_v20 = vmul.f32 %v2264_v13, %v2680_v12 }
 0x311   : > { %2269 = vrsqrt.f32 %v1462_v15  ;;  %v1448_v1 = vmul.f32 0.03125, %v1428_v53  ;;  %v1513_v21 = vmul.f32 %v2761_v25, %v1490_v19  ;;  %v1551_v33 = vmax.f32 %v1535_v11, 0.0 }
 0x312   : > { %v2266_v26 = vpop.eup %2265  ;;  %2271 = vrsqrt.f32 %v1463_v17  ;;  %v1514_v27 = vmul.f32 %v2761_v25, %v1491_v20 }
 0x313   : > { %v1464_v28 = vadd.f32 1e-05, %v1448_v1  ;;  %v1536_v31 = vadd.f32 %v2768_v37, %v1513_v21  ;;  %v1492_v32 = vmul.f32 %v2266_v26, %v2688_v14 }
 0x314   : > { %v1537_v12 = vadd.f32 %v2768_v37, %v1514_v27 }
 0x315   : > { %2273 = vrsqrt.f32 %v1464_v28  ;;  %v1552_v8 = vmax.f32 %v1536_v31, 0.0  ;;  %v1515_v18 = vmul.f32 %v2761_v25, %v1492_v32 }
 0x316   : > { %v1553_v42 = vmax.f32 %v1537_v12, 0.0 }
 0x317   : > { %v1565_v38 = vpack.c.bf16 %v1552_v8, %v1551_v33  ;;  %v1538_v22 = vadd.f32 %v2768_v37, %v1515_v18 }
 0x318   : > { %v1430_v23 = vpop.xlane.xlu0 %1429 }
 0x319   : > { %v1449_v41 = vmul.f32 0.03125, %v1430_v23  ;;  %2135 = vmatprep.mubr.bf16.mxu1 %v1565_v38  ;;  %v1554_v48 = vmax.f32 %v1538_v22, 0.0  ;;  %v1911_v38 = vld [vmem:[%s2855_s10] ss:$0 sm:$0xff] }
 0x31a   : > { %v2268_v44 = vpop.eup %2267 }
 0x31b   : > { %v1465_v24 = vadd.f32 1e-05, %v1449_v41  ;;  %v1566_v45 = vpack.c.bf16 %v1554_v48, %v1553_v42  ;;  %v1493_v14 = vmul.f32 %v2268_v44, %v2700_v29 }
 0x31c   : > { %v1432_v46 = vpop.xlane.xlu1 %1431  ;;  %v1434_v47 = vpop.xlane.xlu0 %1433 }
 0x31d   : > { %2275 = vrsqrt.f32 %v1465_v24  ;;  %v1450_v49 = vmul.f32 0.03125, %v1432_v46  ;;  %v1451_v50 = vmul.f32 0.03125, %v1434_v47  ;;  %2136 = vmatmul.mubr.bf16.gmra.mxu1 %v1566_v45  ;;  %v1516_v51 = vmul.f32 %v2761_v25, %v1493_v14 }
 0x31e   : > { %v2270_v55 = vpop.eup %2269 }
 0x31f   : > { %v2272_v56 = vpop.eup %2271  ;;  %v1466_v54 = vadd.f32 1e-05, %v1450_v49  ;;  %v1467_v52 = vadd.f32 1e-05, %v1451_v50  ;;  %v1494_v58 = vmul.f32 %v2270_v55, %v2710_v39  ;;  %v1539_v60 = vadd.f32 %v2768_v37, %v1516_v51 }
 0x320   : > { %v1436_v59 = vpop.xlane.xlu1 %1435  ;;  %v1495_v61 = vmul.f32 %v2272_v56, %v2713_v40 }
 0x321   : > { %2277 = vrsqrt.f32 %v1466_v54  ;;  %v1452_v29 = vmul.f32 0.03125, %v1436_v59  ;;  %v1517_v62 = vmul.f32 %v2761_v25, %v1494_v58  ;;  %v1555_v4 = vmax.f32 %v1539_v60, 0.0 }
 0x322   : > { %v2274_v0 = vpop.eup %2273  ;;  %2279 = vrsqrt.f32 %v1467_v52  ;;  %v1518_v2 = vmul.f32 %v2761_v25, %v1495_v61 }
 0x323   : > { %v1468_v34 = vadd.f32 1e-05, %v1452_v29  ;;  %v1540_v16 = vadd.f32 %v2768_v37, %v1517_v62  ;;  %v1496_v3 = vmul.f32 %v2274_v0, %v2724_v43 }
 0x324   : > { %v1541_v40 = vadd.f32 %v2768_v37, %v1518_v2 }
 0x325   : > { %2281 = vrsqrt.f32 %v1468_v34  ;;  %v1556_v39 = vmax.f32 %v1540_v16, 0.0  ;;  %v1519_v6 = vmul.f32 %v2761_v25, %v1496_v3 }
 0x326   : > { %v1557_v36 = vmax.f32 %v1541_v40, 0.0 }
 0x327   : > { %v1567_v7 = vpack.c.bf16 %v1556_v39, %v1555_v4  ;;  %v1542_v5 = vadd.f32 %v2768_v37, %v1519_v6 }
 0x329   : > { %2139 = vmatprep.mubr.bf16.mxu1 %v1567_v7  ;;  %v1558_v9 = vmax.f32 %v1542_v5, 0.0 }
 0x32a   : > { %v2276_v10 = vpop.eup %2275 }
 0x32b   : > { %v1568_v13 = vpack.c.bf16 %v1558_v9, %v1557_v36  ;;  %v1497_v15 = vmul.f32 %v2276_v10, %v2736_v57 }
 0x32d   : > { %2140 = vmatmul.mubr.bf16.gmra.mxu1 %v1568_v13  ;;  %v1520_v43 = vmul.f32 %v2761_v25, %v1497_v15 }
 0x32e   : > { %v2278_v17 = vpop.eup %2277 }
 0x32f   : > { %v2280_v19 = vpop.eup %2279  ;;  %v1498_v53 = vmul.f32 %v2278_v17, %v2743_v30  ;;  %v1543_v1 = vadd.f32 %v2768_v37, %v1520_v43 }
 0x330   : > { %v1499_v11 = vmul.f32 %v2280_v19, %v2746_v63 }
 0x331   : > { %v1521_v20 = vmul.f32 %v2761_v25, %v1498_v53  ;;  %v1559_v28 = vmax.f32 %v1543_v1, 0.0 }
 0x332   : > { %v2282_v21 = vpop.eup %2281  ;;  %v1522_v26 = vmul.f32 %v2761_v25, %v1499_v11 }
 0x333   : > { %v1544_v27 = vadd.f32 %v2768_v37, %v1521_v20  ;;  %v1500_v57 = vmul.f32 %v2282_v21, %v2754_v35 }
 0x334   : > { %v1545_v30 = vadd.f32 %v2768_v37, %v1522_v26 }
 0x335   : > { %v1560_v31 = vmax.f32 %v1544_v27, 0.0  ;;  %v1523_v32 = vmul.f32 %v2761_v25, %v1500_v57 }
 0x336   : > { %v1561_v8 = vmax.f32 %v1545_v30, 0.0 }
 0x337   : > { %v1569_v33 = vpack.c.bf16 %v1560_v31, %v1559_v28  ;;  %v1546_v63 = vadd.f32 %v2768_v37, %v1523_v32 }
 0x339   : > { %2143 = vmatprep.mubr.bf16.mxu1 %v1569_v33  ;;  %v1562_v18 = vmax.f32 %v1546_v63, 0.0 }
 0x33b   : > { %v1570_v12 = vpack.c.bf16 %v1562_v18, %v1561_v8 }
 0x33d   : > { %2144 = vmatmul.mubr.bf16.gmra.mxu1 %v1570_v12 }
 0x3cd   : > { %v2133_v35 = vpop.f32.mrf.mxu1 }
 0x3ce   : > { %v1685_v25 = vadd.f32 %v2133_v35, %v1911_v38 }
 0x3cf   : > { %v1676_v37 = vpop.f32.mrf.mxu1 }
 0x3d0   : > { %1741 = vst [vmem:[%s2824_s12 + $0x10] sm:$0xff] %v1685_v25  ;;  %v1677_v22 = vadd.f32 %v1911_v38, %v1676_v37 }
 0x3d1   : > { %v2134_v23 = vpop.f32.mrf.mxu1 }
 0x3d2   : > { %1739 = vst [vmem:[%s2824_s12] sm:$0xff] %v1677_v22  ;;  %v1688_v41 = vadd.f32 %v2134_v23, %v1911_v38 }
 0x3d3   : > { %v1679_v42 = vpop.f32.mrf.mxu1 }
 0x3d4   : > { %1742 = vst [vmem:[%s2824_s12 + $0x18] sm:$0xff] %v1688_v41  ;;  %v1680_v48 = vadd.f32 %v1911_v38, %v1679_v42 }
 0x3d6   : > { %1740 = vst [vmem:[%s2824_s12 + $0x8] sm:$0xff] %v1680_v48 }
 0x3dd   : > { %v2137_v44 = vpop.f32.mrf.mxu1 }
 0x3de   : > { %v1701_v24 = vadd.f32 %v2137_v44, %v1911_v38 }
 0x3df   : > { %v1692_v45 = vpop.f32.mrf.mxu1 }
 0x3e0   : > { %1745 = vst [vmem:[%s2824_s12 + $0x30] sm:$0xff] %v1701_v24  ;;  %v1693_v14 = vadd.f32 %v1911_v38, %v1692_v45 }
 0x3e1   : > { %v2138_v46 = vpop.f32.mrf.mxu1 }
 0x3e2   : > { %1743 = vst [vmem:[%s2824_s12 + $0x20] sm:$0xff] %v1693_v14  ;;  %v1704_v47 = vadd.f32 %v2138_v46, %v1911_v38 }
 0x3e3   : > { %v1695_v49 = vpop.f32.mrf.mxu1 }
 0x3e4   : > { %1746 = vst [vmem:[%s2824_s12 + $0x38] sm:$0xff] %v1704_v47  ;;  %v1696_v50 = vadd.f32 %v1911_v38, %v1695_v49 }
 0x3e6   : > { %1744 = vst [vmem:[%s2824_s12 + $0x28] sm:$0xff] %v1696_v50 }
 0x3ed   : > { %v2141_v51 = vpop.f32.mrf.mxu1 }
 0x3ee   : > { %v1717_v55 = vadd.f32 %v2141_v51, %v1911_v38 }
 0x3ef   : > { %v1708_v56 = vpop.f32.mrf.mxu1 }
 0x3f0   : > { %1749 = vst [vmem:[%s2824_s12 + $0x50] sm:$0xff] %v1717_v55  ;;  %v1709_v54 = vadd.f32 %v1911_v38, %v1708_v56 }
 0x3f1   : > { %v2142_v52 = vpop.f32.mrf.mxu1 }
 0x3f2   : > { %1747 = vst [vmem:[%s2824_s12 + $0x40] sm:$0xff] %v1709_v54  ;;  %v1720_v58 = vadd.f32 %v2142_v52, %v1911_v38 }
 0x3f3   : > { %v1711_v59 = vpop.f32.mrf.mxu1 }
 0x3f4   : > { %1750 = vst [vmem:[%s2824_s12 + $0x58] sm:$0xff] %v1720_v58  ;;  %v1712_v60 = vadd.f32 %v1911_v38, %v1711_v59 }
 0x3f6   : > { %1748 = vst [vmem:[%s2824_s12 + $0x48] sm:$0xff] %v1712_v60 }
 0x3fd   : > { %v2145_v61 = vpop.f32.mrf.mxu1 }
 0x3fe   : > { %v1733_v29 = vadd.f32 %v2145_v61, %v1911_v38 }
 0x3ff   : > { %v1724_v62 = vpop.f32.mrf.mxu1 }
 0x400   : > { %1753 = vst [vmem:[%s2824_s12 + $0x70] sm:$0xff] %v1733_v29  ;;  %v1725_v0 = vadd.f32 %v1911_v38, %v1724_v62 }
 0x401   : > { %v2146_v2 = vpop.f32.mrf.mxu1 }
 0x402   : > { %1751 = vst [vmem:[%s2824_s12 + $0x60] sm:$0xff] %v1725_v0  ;;  %v1736_v34 = vadd.f32 %v2146_v2, %v1911_v38 }
 0x403   : > { %v1727_v16 = vpop.f32.mrf.mxu1 }
 0x404   : > { %1754 = vst [vmem:[%s2824_s12 + $0x78] sm:$0xff] %v1736_v34  ;;  %v1728_v3 = vadd.f32 %v1911_v38, %v1727_v16 }
 0x406   : > { %1752 = vst [vmem:[%s2824_s12 + $0x68] sm:$0xff] %v1728_v3 }
 0x407 PF: > { %s22_s19 = sadd.s32 1, %s2289_s19  }
 0x408   : > { %p19_p4 = scmp.ge.s32.totalorder %s22_s19, 4  }
 0x40a   :  { %21 = sbr.rel (!%p19_p4) target bundleno = 2 (0x2), region = 97 }

</bundles_post_ra>
